<compile_context>
chip_gen: v6e
topology: v6e:2x2x1
jax: 0.10.0
libtpu: 0.0.40
codegen_flags: <defaults>
</compile_context>

<pallas_src>
import functools
import math

import jax
import jax.numpy as jnp
from jax.experimental import pallas as pl
from jax.experimental.pallas import tpu as pltpu

LN_EPS = 1e-5
INV_SQRT2 = 0.7071067811865476
SQRT_2_OVER_PI = 0.7978845608028654


# ----------------------------------------------------------------------------- kernel
def transformer_block_kernel(
    x_ref,                        # (B*S, D) activations
    ln1_w, ln1_b,                 # (1, D)
    wqT, wkT, wvT,                # (H, D, dh) per-head in-proj weights (q pre-scaled)
    bq, bk, bv,                   # (H, 1, dh) per-head in-proj biases (q pre-scaled)
    woT, out_b,                   # (H, dh, D), (1, D)  per-head out-proj slices + bias
    ln2_w, ln2_b,                 # (1, D)
    w1T, b1,                      # (D, Hm), (1, Hm)    mlp fc1
    w2T, b2,                      # (Hm, D), (1, D)     mlp fc2
    sp_wT, sp_b,                  # (D, D),  (1, D)     state_proj
    x_out_ref,                    # (B*S, D)
    h_out_ref,                    # (B, D)
    *, batch, seq, num_heads, mm_dtype, fast_math,
):
    BS, D = x_ref.shape
    dh = D // num_heads

    def layernorm(v, w_ref, b_ref):               # f32 elementwise (v5e-safe)
        mu = jnp.mean(v, axis=-1, keepdims=True)
        var = jnp.mean((v - mu) ** 2, axis=-1, keepdims=True)
        return (v - mu) * jax.lax.rsqrt(var + LN_EPS) * w_ref[...] + b_ref[...]

    def mm(a, w, b=None):                         # MXU dot, f32 accumulate, f32 bias
        out = jnp.dot(a, w, preferred_element_type=jnp.float32)
        return out if b is None else out + b

    x = x_ref[...].astype(jnp.float32)            # (B*S, D)

    # ---- attention branch ---------------------------------------------------
    xn = layernorm(x, ln1_w, ln1_b)
    xn_mm = xn.astype(mm_dtype)                   # single hoisted cast (no-op on f32 path)

    # Per-head attention; each head's contribution to the out-projection is accumulated
    # directly -> no (B,S,D) scratch, no masked stores, no lane-misaligned slices.
    attn_proj = jnp.zeros((BS, D), jnp.float32)
    for h in range(num_heads):                    # static unroll (num_heads small)
        qh = mm(xn_mm, wqT[h], bq[h]).reshape(batch, seq, dh).astype(mm_dtype)
        kh = mm(xn_mm, wkT[h], bk[h]).reshape(batch, seq, dh).astype(mm_dtype)
        vh = mm(xn_mm, wvT[h], bv[h]).reshape(batch, seq, dh).astype(mm_dtype)

        s = jnp.einsum("bqd,bkd->bqk", qh, kh, preferred_element_type=jnp.float32)
        s = s - jnp.max(s, axis=-1, keepdims=True)
        p = jnp.exp(s)
        denom = jnp.sum(p, axis=-1, keepdims=True)
        if fast_math:
            p = p * pl.reciprocal(denom, approx=True)    # EUP slot
        else:
            p = p / denom                                # exact path
        ah = jnp.einsum("bqk,bkd->bqd", p.astype(mm_dtype), vh,
                        preferred_element_type=jnp.float32)      # (B, S, dh) f32
        attn_proj = attn_proj + mm(ah.reshape(BS, dh).astype(mm_dtype), woT[h])

    x = x + attn_proj + out_b[...]

    # ---- MLP branch ---------------------------------------------------------
    xn2 = layernorm(x, ln2_w, ln2_b)
    h1 = mm(xn2.astype(mm_dtype), w1T[...], b1[...])
    if fast_math:
        # tanh-approximate GELU (EUP); deviates slightly from PyTorch's default exact GELU.
        h1 = 0.5 * h1 * (1.0 + jnp.tanh(SQRT_2_OVER_PI * (h1 + 0.044715 * h1 * h1 * h1)))
    else:
        h1 = 0.5 * h1 * (1.0 + jax.lax.erf(h1 * INV_SQRT2))      # exact (PyTorch default)
    x = x + mm(h1.astype(mm_dtype), w2T[...], b2[...])

    # ---- outputs ------------------------------------------------------------
    x_out_ref[...] = x.astype(x_out_ref.dtype)
    xm = jnp.mean(x.reshape(batch, seq, D), axis=1)               # (B, D) mean over sequence
    h_out_ref[...] = mm(xm.astype(mm_dtype), sp_wT[...], sp_b[...]).astype(h_out_ref.dtype)


# ----------------------------------------------------------------------------- params prep
ARG_ORDER = ("ln1_w", "ln1_b", "wqT", "wkT", "wvT", "bq", "bk", "bv", "woT", "out_b",
             "ln2_w", "ln2_b", "w1T", "b1", "w2T", "b2", "sp_wT", "sp_b")


def prepare_params(params, num_heads, matmul_dtype=jnp.float32):
    """Host-side, once-per-model weight prep:
      * splits the packed (3D, D) in-projection into per-head (D, dh) stacks so q/k/v are
        born lane-contiguous (no qkv[:, D:2D] lane-misaligned splits in the kernel),
      * folds 1/sqrt(dh) into the q weights/bias,
      * splits the out-projection into per-head (dh, D) slices for direct accumulation,
      * pre-transposes all Linear weights,
      * optionally casts matmul weights to bf16 (v6e/v7x: ~2x MXU throughput, half the VMEM).
        On v5e at tiny K keep f32 (no bf16 VPU -> casts are pure VALU overhead).
    LayerNorm params and all biases stay f32.
    TODO(synk): add a v6e-only int8 weight path (v7x MXU dropped int support)."""
    D = params["out_w"].shape[0]
    dh = D // num_heads
    scale = 1.0 / math.sqrt(dh)

    f32 = lambda v: jnp.asarray(v, jnp.float32)
    r2 = lambda v: f32(v).reshape(1, -1)

    in_w, in_b = f32(params["in_w"]), f32(params["in_b"])          # (3D, D), (3D,)
    wq, wk, wv = in_w[:D], in_w[D:2 * D], in_w[2 * D:]
    bq_, bk_, bv_ = in_b[:D], in_b[D:2 * D], in_b[2 * D:]
    out_w = f32(params["out_w"])                                   # (D, D)

    def head_wT(w, s=1.0):     # (D, D) row-sliced per head, transposed -> (H, D, dh)
        return jnp.stack([(w[h * dh:(h + 1) * dh, :] * s).T for h in range(num_heads)],
                         axis=0).astype(matmul_dtype)

    def head_b(b, s=1.0):      # (D,) -> (H, 1, dh), kept f32
        return jnp.stack([(b[h * dh:(h + 1) * dh] * s).reshape(1, dh)
                          for h in range(num_heads)], axis=0)

    woT = jnp.stack([out_w[:, h * dh:(h + 1) * dh].T for h in range(num_heads)],
                    axis=0).astype(matmul_dtype)                   # (H, dh, D)

    wc = lambda w: f32(w).T.astype(matmul_dtype)
    return {
        "ln1_w": r2(params["ln1_w"]), "ln1_b": r2(params["ln1_b"]),
        "wqT": head_wT(wq, scale), "wkT": head_wT(wk), "wvT": head_wT(wv),
        "bq": head_b(bq_, scale), "bk": head_b(bk_), "bv": head_b(bv_),
        "woT": woT, "out_b": r2(params["out_b"]),
        "ln2_w": r2(params["ln2_w"]), "ln2_b": r2(params["ln2_b"]),
        "w1T": wc(params["w1"]), "b1": r2(params["b1"]),
        "w2T": wc(params["w2"]), "b2": r2(params["b2"]),
        "sp_wT": wc(params["sp_w"]), "sp_b": r2(params["sp_b"]),
    }


# ----------------------------------------------------------------------------- wrapper
def transformer_block_pallas(x, prepared, num_heads, *, fast_math=False):
    B, S, D = x.shape
    BS = B * S
    Hm = prepared["w1T"].shape[1]
    mm_dtype = prepared["w1T"].dtype

    x2 = x.reshape(BS, D)                                  # flatten (B,S) for all matmuls
    weight_args = [prepared[k] for k in ARG_ORDER]

    vmem_spec = pl.BlockSpec(memory_space=pltpu.MemorySpace.VMEM)
    in_specs = [vmem_spec] * (1 + len(weight_args))
    out_specs = [vmem_spec, vmem_spec]
    out_shapes = [jax.ShapeDtypeStruct((BS, D), x.dtype),  # x_out
                  jax.ShapeDtypeStruct((B, D), x.dtype)]   # h_new

    # --- VMEM limit: exact footprint + margin, capped at 75% of device VMEM (v7x-safe) ----
    nbytes = lambda a: int(a.size) * a.dtype.itemsize
    in_bytes = nbytes(x2) + sum(nbytes(w) for w in weight_args)
    out_bytes = (BS * D + B * D) * x.dtype.itemsize
    work_bytes = 4 * (4 * BS * D + 2 * BS * Hm + B * num_heads * S * S)   # f32 intermediates
    try:
        vmem_cap = int(pltpu.get_tpu_info().vmem_capacity_bytes)
    except Exception:
        vmem_cap = 64 * 1024 * 1024                        # conservative (v7x) fallback
    vmem_limit = int(min(vmem_cap * 3 // 4,
                         max(8 * 1024 * 1024,
                             2 * (in_bytes + out_bytes) + work_bytes + 2 * 1024 * 1024)))

    # --- advisory cost estimate (all matmul flops, all transcendentals, all HBM bytes) ----
    flops = (2 * BS * D * 3 * D        # per-head qkv projections (same total as packed)
             + 4 * B * S * S * D       # QK^T + PV over all heads
             + 2 * BS * D * D          # out-projection (accumulated per head)
             + 4 * BS * D * Hm         # fc1 + fc2
             + 2 * B * D * D)          # state proj
    transcendentals = (B * num_heads * S * S     # softmax exp
                       + B * num_heads * S       # softmax reciprocal/divide
                       + BS * Hm                 # gelu erf/tanh
                       + 4 * BS)                 # layernorm rsqrt
    bytes_accessed = in_bytes + out_bytes

    x_out2, h_out = pl.pallas_call(
        functools.partial(
            transformer_block_kernel,
            batch=B, seq=S, num_heads=num_heads,
            mm_dtype=mm_dtype, fast_math=fast_math),
        out_shape=out_shapes,
        in_specs=in_specs,
        out_specs=out_specs,
        compiler_params=pltpu.CompilerParams(vmem_limit_bytes=vmem_limit),
        cost_estimate=pl.CostEstimate(flops=int(flops),
                                      transcendentals=int(transcendentals),
                                      bytes_accessed=int(bytes_accessed)),
    )(x2, *weight_args)
    return x_out2.reshape(B, S, D), h_out


# ----------------------------------------------------------------------------- pure-JAX reference
def transformer_block_ref(x, p, num_heads):
    def ln(v, w, b):
        mu = v.mean(-1, keepdims=True)
        var = ((v - mu) ** 2).mean(-1, keepdims=True)
        return (v - mu) / jnp.sqrt(var + LN_EPS) * w + b

    B, S, D = x.shape
    dh = D // num_heads
    xn = ln(x, p["ln1_w"], p["ln1_b"])
    qkv = xn @ p["in_w"].T + p["in_b"]
    q, k, v = jnp.split(qkv, 3, axis=-1)
    sh = lambda t: t.reshape(B, S, num_heads, dh).transpose(0, 2, 1, 3)
    qh, kh, vh = sh(q), sh(k), sh(v)
    s = (qh @ kh.transpose(0, 1, 3, 2)) / jnp.sqrt(jnp.float32(dh))
    a = jax.nn.softmax(s, axis=-1) @ vh
    a = a.transpose(0, 2, 1, 3).reshape(B, S, D)
    a = a @ p["out_w"].T + p["out_b"]
    x = x + a
    xn2 = ln(x, p["ln2_w"], p["ln2_b"])
    h1 = xn2 @ p["w1"].T + p["b1"]
    h1 = 0.5 * h1 * (1.0 + jax.lax.erf(h1 * INV_SQRT2))
    x = x + h1 @ p["w2"].T + p["b2"]
    h_new = x.mean(axis=1) @ p["sp_w"].T + p["sp_b"]
    return x, h_new


# ----------------------------------------------------------------------------- main
if __name__ == "__main__":
    B, S, D = 2, 8, 32
    NUM_HEADS = 4
    MLP_RATIO = 4.0
    H = int(D * MLP_RATIO)

    key = jax.random.PRNGKey(0)
    keys = jax.random.split(key, 16)

    params = {
        "ln1_w": jnp.ones((D,), jnp.float32) + 0.01 * jax.random.normal(keys[0], (D,)),
        "ln1_b": 0.01 * jax.random.normal(keys[1], (D,)),
        "in_w": 0.05 * jax.random.normal(keys[2], (3 * D, D)),
        "in_b": 0.01 * jax.random.normal(keys[3], (3 * D,)),
        "out_w": 0.05 * jax.random.normal(keys[4], (D, D)),
        "out_b": 0.01 * jax.random.normal(keys[5], (D,)),
        "ln2_w": jnp.ones((D,), jnp.float32) + 0.01 * jax.random.normal(keys[6], (D,)),
        "ln2_b": 0.01 * jax.random.normal(keys[7], (D,)),
        "w1": 0.05 * jax.random.normal(keys[8], (H, D)),
        "b1": 0.01 * jax.random.normal(keys[9], (H,)),
        "w2": 0.05 * jax.random.normal(keys[10], (D, H)),
        "b2": 0.01 * jax.random.normal(keys[11], (D,)),
        "sp_w": 0.05 * jax.random.normal(keys[12], (D, D)),
        "sp_b": 0.01 * jax.random.normal(keys[13], (D,)),
    }
    params = {k: v.astype(jnp.float32) for k, v in params.items()}
    x = jax.random.normal(keys[14], (B, S, D), dtype=jnp.float32)

    x_ref, h_ref = transformer_block_ref(x, params, NUM_HEADS)

    # --- exact path: f32 MXU, exact softmax divide, exact erf GELU ------------
    prep_f32 = prepare_params(params, NUM_HEADS, jnp.float32)
    x_out, h_new = transformer_block_pallas(x, prep_f32, NUM_HEADS, fast_math=False)
    jax.block_until_ready((x_out, h_new))
    assert jnp.allclose(x_out, x_ref, atol=1e-4, rtol=1e-4), "x mismatch (f32 exact path)"
    assert jnp.allclose(h_new, h_ref, atol=1e-4, rtol=1e-4), "h_new mismatch (f32 exact path)"

    # --- bf16 MXU weights, exact softmax/GELU (precision choices decoupled) ---
    prep_bf16 = prepare_params(params, NUM_HEADS, jnp.bfloat16)
    x_out_b, h_new_b = transformer_block_pallas(x, prep_bf16, NUM_HEADS, fast_math=False)
    jax.block_until_ready((x_out_b, h_new_b))
    assert jnp.allclose(x_out_b, x_ref, atol=5e-2, rtol=5e-2), "x mismatch (bf16 exact path)"
    assert jnp.allclose(h_new_b, h_ref, atol=5e-2, rtol=5e-2), "h_new mismatch (bf16 exact path)"

    # --- bf16 MXU weights + fast-math (approx softmax recip, tanh GELU) -------
    x_out_f, h_new_f = transformer_block_pallas(x, prep_bf16, NUM_HEADS, fast_math=True)
    jax.block_until_ready((x_out_f, h_new_f))
    assert jnp.allclose(x_out_f, x_ref, atol=5e-2, rtol=5e-2), "x mismatch (bf16 fast path)"
    assert jnp.allclose(h_new_f, h_ref, atol=5e-2, rtol=5e-2), "h_new mismatch (bf16 fast path)"

    print("KERNEL_OK")
</pallas_src>

<mosaic_0001>
module attributes {stable_mosaic.version = 11 : i64} {
  func.func @transformer_block_kernel(%arg0: memref<16x32xf32, #tpu.memory_space<vmem>>, %arg1: memref<1x32xf32, #tpu.memory_space<vmem>>, %arg2: memref<1x32xf32, #tpu.memory_space<vmem>>, %arg3: memref<4x32x8xf32, #tpu.memory_space<vmem>>, %arg4: memref<4x32x8xf32, #tpu.memory_space<vmem>>, %arg5: memref<4x32x8xf32, #tpu.memory_space<vmem>>, %arg6: memref<4x1x8xf32, #tpu.memory_space<vmem>>, %arg7: memref<4x1x8xf32, #tpu.memory_space<vmem>>, %arg8: memref<4x1x8xf32, #tpu.memory_space<vmem>>, %arg9: memref<4x8x32xf32, #tpu.memory_space<vmem>>, %arg10: memref<1x32xf32, #tpu.memory_space<vmem>>, %arg11: memref<1x32xf32, #tpu.memory_space<vmem>>, %arg12: memref<1x32xf32, #tpu.memory_space<vmem>>, %arg13: memref<32x128xf32, #tpu.memory_space<vmem>>, %arg14: memref<1x128xf32, #tpu.memory_space<vmem>>, %arg15: memref<128x32xf32, #tpu.memory_space<vmem>>, %arg16: memref<1x32xf32, #tpu.memory_space<vmem>>, %arg17: memref<32x32xf32, #tpu.memory_space<vmem>>, %arg18: memref<1x32xf32, #tpu.memory_space<vmem>>, %arg19: memref<16x32xf32, #tpu.memory_space<vmem>>, %arg20: memref<2x32xf32, #tpu.memory_space<vmem>>) attributes {dimension_semantics = [], scalar_prefetch = 0 : i64, scratch_operands = 0 : i64, tpu.core_type = #tpu.core_type<tc>} {
    %c0 = arith.constant 0 : index
    %c0_0 = arith.constant 0 : index
    %0 = vector.load %arg0[%c0, %c0_0] : memref<16x32xf32, #tpu.memory_space<vmem>>, vector<16x32xf32>
    %cst = arith.constant dense<0.000000e+00> : vector<16xf32>
    %1 = vector.multi_reduction <add>, %0, %cst [1] : vector<16x32xf32> to vector<16xf32>
    %2 = vector.shape_cast %1 : vector<16xf32> to vector<16x1xf32>
    %cst_1 = arith.constant 3.200000e+01 : f32
    %3 = vector.broadcast %cst_1 : f32 to vector<16x1xf32>
    %4 = arith.divf %2, %3 : vector<16x1xf32>
    %5 = vector.broadcast %4 : vector<16x1xf32> to vector<16x32xf32>
    %6 = arith.subf %0, %5 : vector<16x32xf32>
    %7 = arith.mulf %6, %6 : vector<16x32xf32>
    %cst_2 = arith.constant dense<0.000000e+00> : vector<16xf32>
    %8 = vector.multi_reduction <add>, %7, %cst_2 [1] : vector<16x32xf32> to vector<16xf32>
    %9 = vector.shape_cast %8 : vector<16xf32> to vector<16x1xf32>
    %cst_3 = arith.constant 3.200000e+01 : f32
    %10 = vector.broadcast %cst_3 : f32 to vector<16x1xf32>
    %11 = arith.divf %9, %10 : vector<16x1xf32>
    %12 = vector.broadcast %4 : vector<16x1xf32> to vector<16x32xf32>
    %13 = arith.subf %0, %12 : vector<16x32xf32>
    %cst_4 = arith.constant 9.99999974E-6 : f32
    %14 = vector.broadcast %cst_4 : f32 to vector<16x1xf32>
    %15 = arith.addf %11, %14 : vector<16x1xf32>
    %16 = math.rsqrt %15 : vector<16x1xf32>
    %17 = vector.broadcast %16 : vector<16x1xf32> to vector<16x32xf32>
    %18 = arith.mulf %13, %17 : vector<16x32xf32>
    %c0_5 = arith.constant 0 : index
    %c0_6 = arith.constant 0 : index
    %19 = vector.load %arg1[%c0_5, %c0_6] : memref<1x32xf32, #tpu.memory_space<vmem>>, vector<1x32xf32>
    %20 = vector.broadcast %19 : vector<1x32xf32> to vector<16x32xf32>
    %21 = arith.mulf %18, %20 : vector<16x32xf32>
    %c0_7 = arith.constant 0 : index
    %c0_8 = arith.constant 0 : index
    %22 = vector.load %arg2[%c0_7, %c0_8] : memref<1x32xf32, #tpu.memory_space<vmem>>, vector<1x32xf32>
    %23 = vector.broadcast %22 : vector<1x32xf32> to vector<16x32xf32>
    %24 = arith.addf %21, %23 : vector<16x32xf32>
    %cst_9 = arith.constant 0.000000e+00 : f32
    %25 = vector.broadcast %cst_9 : f32 to vector<16x32xf32>
    %c0_10 = arith.constant 0 : index
    %c0_11 = arith.constant 0 : index
    %c0_12 = arith.constant 0 : index
    %26 = vector.load %arg3[%c0_10, %c0_11, %c0_12] : memref<4x32x8xf32, #tpu.memory_space<vmem>>, vector<1x32x8xf32>
    %27 = vector.shape_cast %26 : vector<1x32x8xf32> to vector<32x8xf32>
    %c0_13 = arith.constant 0 : index
    %c0_14 = arith.constant 0 : index
    %c0_15 = arith.constant 0 : index
    %28 = vector.load %arg6[%c0_13, %c0_14, %c0_15] : memref<4x1x8xf32, #tpu.memory_space<vmem>>, vector<1x1x8xf32>
    %29 = vector.shape_cast %28 : vector<1x1x8xf32> to vector<1x8xf32>
    %cst_16 = arith.constant dense<0.000000e+00> : vector<16x8xf32>
    %30 = tpu.matmul %24, %27, %cst_16 {dimension_numbers = #tpu.dot_dimension_numbers<[1], [0], [0], [1], [0, 0, 1, 1], [], []>} : vector<16x32xf32>, vector<32x8xf32>, vector<16x8xf32> -> vector<16x8xf32>
    %31 = vector.broadcast %29 : vector<1x8xf32> to vector<16x8xf32>
    %32 = arith.addf %30, %31 : vector<16x8xf32>
    %33 = vector.shape_cast %32 : vector<16x8xf32> to vector<2x8x8xf32>
    %c0_17 = arith.constant 0 : index
    %c0_18 = arith.constant 0 : index
    %c0_19 = arith.constant 0 : index
    %34 = vector.load %arg4[%c0_17, %c0_18, %c0_19] : memref<4x32x8xf32, #tpu.memory_space<vmem>>, vector<1x32x8xf32>
    %35 = vector.shape_cast %34 : vector<1x32x8xf32> to vector<32x8xf32>
    %c0_20 = arith.constant 0 : index
    %c0_21 = arith.constant 0 : index
    %c0_22 = arith.constant 0 : index
    %36 = vector.load %arg7[%c0_20, %c0_21, %c0_22] : memref<4x1x8xf32, #tpu.memory_space<vmem>>, vector<1x1x8xf32>
    %37 = vector.shape_cast %36 : vector<1x1x8xf32> to vector<1x8xf32>
    %cst_23 = arith.constant dense<0.000000e+00> : vector<16x8xf32>
    %38 = tpu.matmul %24, %35, %cst_23 {dimension_numbers = #tpu.dot_dimension_numbers<[1], [0], [0], [1], [0, 0, 1, 1], [], []>} : vector<16x32xf32>, vector<32x8xf32>, vector<16x8xf32> -> vector<16x8xf32>
    %39 = vector.broadcast %37 : vector<1x8xf32> to vector<16x8xf32>
    %40 = arith.addf %38, %39 : vector<16x8xf32>
    %41 = vector.shape_cast %40 : vector<16x8xf32> to vector<2x8x8xf32>
    %c0_24 = arith.constant 0 : index
    %c0_25 = arith.constant 0 : index
    %c0_26 = arith.constant 0 : index
    %42 = vector.load %arg5[%c0_24, %c0_25, %c0_26] : memref<4x32x8xf32, #tpu.memory_space<vmem>>, vector<1x32x8xf32>
    %43 = vector.shape_cast %42 : vector<1x32x8xf32> to vector<32x8xf32>
    %c0_27 = arith.constant 0 : index
    %c0_28 = arith.constant 0 : index
    %c0_29 = arith.constant 0 : index
    %44 = vector.load %arg8[%c0_27, %c0_28, %c0_29] : memref<4x1x8xf32, #tpu.memory_space<vmem>>, vector<1x1x8xf32>
    %45 = vector.shape_cast %44 : vector<1x1x8xf32> to vector<1x8xf32>
    %cst_30 = arith.constant dense<0.000000e+00> : vector<16x8xf32>
    %46 = tpu.matmul %24, %43, %cst_30 {dimension_numbers = #tpu.dot_dimension_numbers<[1], [0], [0], [1], [0, 0, 1, 1], [], []>} : vector<16x32xf32>, vector<32x8xf32>, vector<16x8xf32> -> vector<16x8xf32>
    %47 = vector.broadcast %45 : vector<1x8xf32> to vector<16x8xf32>
    %48 = arith.addf %46, %47 : vector<16x8xf32>
    %49 = vector.shape_cast %48 : vector<16x8xf32> to vector<2x8x8xf32>
    "tpu.trace_start"() <{level = 10 : i32, message = "bqd,bkd->bqk"}> : () -> ()
    %cst_31 = arith.constant dense<0.000000e+00> : vector<2x8x8xf32>
    %50 = tpu.matmul %33, %41, %cst_31 {dimension_numbers = #tpu.dot_dimension_numbers<[2], [2], [1], [1], [0, 0, 0, 1, 1, 1], [0], [0]>} : vector<2x8x8xf32>, vector<2x8x8xf32>, vector<2x8x8xf32> -> vector<2x8x8xf32>
    "tpu.trace_stop"() : () -> ()
    %cst_32 = arith.constant dense<0xFF800000> : vector<2x8xf32>
    %51 = vector.multi_reduction <maximumf>, %50, %cst_32 [2] : vector<2x8x8xf32> to vector<2x8xf32>
    %52 = vector.shape_cast %51 : vector<2x8xf32> to vector<2x8x1xf32>
    %53 = vector.broadcast %52 : vector<2x8x1xf32> to vector<2x8x8xf32>
    %54 = arith.subf %50, %53 : vector<2x8x8xf32>
    %55 = math.exp %54 : vector<2x8x8xf32>
    %cst_33 = arith.constant dense<0.000000e+00> : vector<2x8xf32>
    %56 = vector.multi_reduction <add>, %55, %cst_33 [2] : vector<2x8x8xf32> to vector<2x8xf32>
    %57 = vector.shape_cast %56 : vector<2x8xf32> to vector<2x8x1xf32>
    %58 = vector.broadcast %57 : vector<2x8x1xf32> to vector<2x8x8xf32>
    %59 = arith.divf %55, %58 : vector<2x8x8xf32>
    "tpu.trace_start"() <{level = 10 : i32, message = "bqk,bkd->bqd"}> : () -> ()
    %cst_34 = arith.constant dense<0.000000e+00> : vector<2x8x8xf32>
    %60 = tpu.matmul %59, %49, %cst_34 {dimension_numbers = #tpu.dot_dimension_numbers<[2], [1], [1], [2], [0, 0, 0, 1, 1, 2], [0], [0]>} : vector<2x8x8xf32>, vector<2x8x8xf32>, vector<2x8x8xf32> -> vector<2x8x8xf32>
    "tpu.trace_stop"() : () -> ()
    %61 = vector.shape_cast %60 : vector<2x8x8xf32> to vector<16x8xf32>
    %c0_35 = arith.constant 0 : index
    %c0_36 = arith.constant 0 : index
    %c0_37 = arith.constant 0 : index
    %62 = vector.load %arg9[%c0_35, %c0_36, %c0_37] : memref<4x8x32xf32, #tpu.memory_space<vmem>>, vector<1x8x32xf32>
    %63 = vector.shape_cast %62 : vector<1x8x32xf32> to vector<8x32xf32>
    %cst_38 = arith.constant dense<0.000000e+00> : vector<16x32xf32>
    %64 = tpu.matmul %61, %63, %cst_38 {dimension_numbers = #tpu.dot_dimension_numbers<[1], [0], [0], [1], [0, 0, 1, 1], [], []>} : vector<16x8xf32>, vector<8x32xf32>, vector<16x32xf32> -> vector<16x32xf32>
    %65 = arith.addf %25, %64 : vector<16x32xf32>
    %c1 = arith.constant 1 : index
    %c0_39 = arith.constant 0 : index
    %c0_40 = arith.constant 0 : index
    %66 = vector.load %arg3[%c1, %c0_39, %c0_40] : memref<4x32x8xf32, #tpu.memory_space<vmem>>, vector<1x32x8xf32>
    %67 = vector.shape_cast %66 : vector<1x32x8xf32> to vector<32x8xf32>
    %c1_41 = arith.constant 1 : index
    %c0_42 = arith.constant 0 : index
    %c0_43 = arith.constant 0 : index
    %68 = vector.load %arg6[%c1_41, %c0_42, %c0_43] : memref<4x1x8xf32, #tpu.memory_space<vmem>>, vector<1x1x8xf32>
    %69 = vector.shape_cast %68 : vector<1x1x8xf32> to vector<1x8xf32>
    %cst_44 = arith.constant dense<0.000000e+00> : vector<16x8xf32>
    %70 = tpu.matmul %24, %67, %cst_44 {dimension_numbers = #tpu.dot_dimension_numbers<[1], [0], [0], [1], [0, 0, 1, 1], [], []>} : vector<16x32xf32>, vector<32x8xf32>, vector<16x8xf32> -> vector<16x8xf32>
    %71 = vector.broadcast %69 : vector<1x8xf32> to vector<16x8xf32>
    %72 = arith.addf %70, %71 : vector<16x8xf32>
    %73 = vector.shape_cast %72 : vector<16x8xf32> to vector<2x8x8xf32>
    %c1_45 = arith.constant 1 : index
    %c0_46 = arith.constant 0 : index
    %c0_47 = arith.constant 0 : index
    %74 = vector.load %arg4[%c1_45, %c0_46, %c0_47] : memref<4x32x8xf32, #tpu.memory_space<vmem>>, vector<1x32x8xf32>
    %75 = vector.shape_cast %74 : vector<1x32x8xf32> to vector<32x8xf32>
    %c1_48 = arith.constant 1 : index
    %c0_49 = arith.constant 0 : index
    %c0_50 = arith.constant 0 : index
    %76 = vector.load %arg7[%c1_48, %c0_49, %c0_50] : memref<4x1x8xf32, #tpu.memory_space<vmem>>, vector<1x1x8xf32>
    %77 = vector.shape_cast %76 : vector<1x1x8xf32> to vector<1x8xf32>
    %cst_51 = arith.constant dense<0.000000e+00> : vector<16x8xf32>
    %78 = tpu.matmul %24, %75, %cst_51 {dimension_numbers = #tpu.dot_dimension_numbers<[1], [0], [0], [1], [0, 0, 1, 1], [], []>} : vector<16x32xf32>, vector<32x8xf32>, vector<16x8xf32> -> vector<16x8xf32>
    %79 = vector.broadcast %77 : vector<1x8xf32> to vector<16x8xf32>
    %80 = arith.addf %78, %79 : vector<16x8xf32>
    %81 = vector.shape_cast %80 : vector<16x8xf32> to vector<2x8x8xf32>
    %c1_52 = arith.constant 1 : index
    %c0_53 = arith.constant 0 : index
    %c0_54 = arith.constant 0 : index
    %82 = vector.load %arg5[%c1_52, %c0_53, %c0_54] : memref<4x32x8xf32, #tpu.memory_space<vmem>>, vector<1x32x8xf32>
    %83 = vector.shape_cast %82 : vector<1x32x8xf32> to vector<32x8xf32>
    %c1_55 = arith.constant 1 : index
    %c0_56 = arith.constant 0 : index
    %c0_57 = arith.constant 0 : index
    %84 = vector.load %arg8[%c1_55, %c0_56, %c0_57] : memref<4x1x8xf32, #tpu.memory_space<vmem>>, vector<1x1x8xf32>
    %85 = vector.shape_cast %84 : vector<1x1x8xf32> to vector<1x8xf32>
    %cst_58 = arith.constant dense<0.000000e+00> : vector<16x8xf32>
    %86 = tpu.matmul %24, %83, %cst_58 {dimension_numbers = #tpu.dot_dimension_numbers<[1], [0], [0], [1], [0, 0, 1, 1], [], []>} : vector<16x32xf32>, vector<32x8xf32>, vector<16x8xf32> -> vector<16x8xf32>
    %87 = vector.broadcast %85 : vector<1x8xf32> to vector<16x8xf32>
    %88 = arith.addf %86, %87 : vector<16x8xf32>
    %89 = vector.shape_cast %88 : vector<16x8xf32> to vector<2x8x8xf32>
    "tpu.trace_start"() <{level = 10 : i32, message = "bqd,bkd->bqk"}> : () -> ()
    %cst_59 = arith.constant dense<0.000000e+00> : vector<2x8x8xf32>
    %90 = tpu.matmul %73, %81, %cst_59 {dimension_numbers = #tpu.dot_dimension_numbers<[2], [2], [1], [1], [0, 0, 0, 1, 1, 1], [0], [0]>} : vector<2x8x8xf32>, vector<2x8x8xf32>, vector<2x8x8xf32> -> vector<2x8x8xf32>
    "tpu.trace_stop"() : () -> ()
    %cst_60 = arith.constant dense<0xFF800000> : vector<2x8xf32>
    %91 = vector.multi_reduction <maximumf>, %90, %cst_60 [2] : vector<2x8x8xf32> to vector<2x8xf32>
    %92 = vector.shape_cast %91 : vector<2x8xf32> to vector<2x8x1xf32>
    %93 = vector.broadcast %92 : vector<2x8x1xf32> to vector<2x8x8xf32>
    %94 = arith.subf %90, %93 : vector<2x8x8xf32>
    %95 = math.exp %94 : vector<2x8x8xf32>
    %cst_61 = arith.constant dense<0.000000e+00> : vector<2x8xf32>
    %96 = vector.multi_reduction <add>, %95, %cst_61 [2] : vector<2x8x8xf32> to vector<2x8xf32>
    %97 = vector.shape_cast %96 : vector<2x8xf32> to vector<2x8x1xf32>
    %98 = vector.broadcast %97 : vector<2x8x1xf32> to vector<2x8x8xf32>
    %99 = arith.divf %95, %98 : vector<2x8x8xf32>
    "tpu.trace_start"() <{level = 10 : i32, message = "bqk,bkd->bqd"}> : () -> ()
    %cst_62 = arith.constant dense<0.000000e+00> : vector<2x8x8xf32>
    %100 = tpu.matmul %99, %89, %cst_62 {dimension_numbers = #tpu.dot_dimension_numbers<[2], [1], [1], [2], [0, 0, 0, 1, 1, 2], [0], [0]>} : vector<2x8x8xf32>, vector<2x8x8xf32>, vector<2x8x8xf32> -> vector<2x8x8xf32>
    "tpu.trace_stop"() : () -> ()
    %101 = vector.shape_cast %100 : vector<2x8x8xf32> to vector<16x8xf32>
    %c1_63 = arith.constant 1 : index
    %c0_64 = arith.constant 0 : index
    %c0_65 = arith.constant 0 : index
    %102 = vector.load %arg9[%c1_63, %c0_64, %c0_65] : memref<4x8x32xf32, #tpu.memory_space<vmem>>, vector<1x8x32xf32>
    %103 = vector.shape_cast %102 : vector<1x8x32xf32> to vector<8x32xf32>
    %cst_66 = arith.constant dense<0.000000e+00> : vector<16x32xf32>
    %104 = tpu.matmul %101, %103, %cst_66 {dimension_numbers = #tpu.dot_dimension_numbers<[1], [0], [0], [1], [0, 0, 1, 1], [], []>} : vector<16x8xf32>, vector<8x32xf32>, vector<16x32xf32> -> vector<16x32xf32>
    %105 = arith.addf %65, %104 : vector<16x32xf32>
    %c2 = arith.constant 2 : index
    %c0_67 = arith.constant 0 : index
    %c0_68 = arith.constant 0 : index
    %106 = vector.load %arg3[%c2, %c0_67, %c0_68] : memref<4x32x8xf32, #tpu.memory_space<vmem>>, vector<1x32x8xf32>
    %107 = vector.shape_cast %106 : vector<1x32x8xf32> to vector<32x8xf32>
    %c2_69 = arith.constant 2 : index
    %c0_70 = arith.constant 0 : index
    %c0_71 = arith.constant 0 : index
    %108 = vector.load %arg6[%c2_69, %c0_70, %c0_71] : memref<4x1x8xf32, #tpu.memory_space<vmem>>, vector<1x1x8xf32>
    %109 = vector.shape_cast %108 : vector<1x1x8xf32> to vector<1x8xf32>
    %cst_72 = arith.constant dense<0.000000e+00> : vector<16x8xf32>
    %110 = tpu.matmul %24, %107, %cst_72 {dimension_numbers = #tpu.dot_dimension_numbers<[1], [0], [0], [1], [0, 0, 1, 1], [], []>} : vector<16x32xf32>, vector<32x8xf32>, vector<16x8xf32> -> vector<16x8xf32>
    %111 = vector.broadcast %109 : vector<1x8xf32> to vector<16x8xf32>
    %112 = arith.addf %110, %111 : vector<16x8xf32>
    %113 = vector.shape_cast %112 : vector<16x8xf32> to vector<2x8x8xf32>
    %c2_73 = arith.constant 2 : index
    %c0_74 = arith.constant 0 : index
    %c0_75 = arith.constant 0 : index
    %114 = vector.load %arg4[%c2_73, %c0_74, %c0_75] : memref<4x32x8xf32, #tpu.memory_space<vmem>>, vector<1x32x8xf32>
    %115 = vector.shape_cast %114 : vector<1x32x8xf32> to vector<32x8xf32>
    %c2_76 = arith.constant 2 : index
    %c0_77 = arith.constant 0 : index
    %c0_78 = arith.constant 0 : index
    %116 = vector.load %arg7[%c2_76, %c0_77, %c0_78] : memref<4x1x8xf32, #tpu.memory_space<vmem>>, vector<1x1x8xf32>
    %117 = vector.shape_cast %116 : vector<1x1x8xf32> to vector<1x8xf32>
    %cst_79 = arith.constant dense<0.000000e+00> : vector<16x8xf32>
    %118 = tpu.matmul %24, %115, %cst_79 {dimension_numbers = #tpu.dot_dimension_numbers<[1], [0], [0], [1], [0, 0, 1, 1], [], []>} : vector<16x32xf32>, vector<32x8xf32>, vector<16x8xf32> -> vector<16x8xf32>
    %119 = vector.broadcast %117 : vector<1x8xf32> to vector<16x8xf32>
    %120 = arith.addf %118, %119 : vector<16x8xf32>
    %121 = vector.shape_cast %120 : vector<16x8xf32> to vector<2x8x8xf32>
    %c2_80 = arith.constant 2 : index
    %c0_81 = arith.constant 0 : index
    %c0_82 = arith.constant 0 : index
    %122 = vector.load %arg5[%c2_80, %c0_81, %c0_82] : memref<4x32x8xf32, #tpu.memory_space<vmem>>, vector<1x32x8xf32>
    %123 = vector.shape_cast %122 : vector<1x32x8xf32> to vector<32x8xf32>
    %c2_83 = arith.constant 2 : index
    %c0_84 = arith.constant 0 : index
    %c0_85 = arith.constant 0 : index
    %124 = vector.load %arg8[%c2_83, %c0_84, %c0_85] : memref<4x1x8xf32, #tpu.memory_space<vmem>>, vector<1x1x8xf32>
    %125 = vector.shape_cast %124 : vector<1x1x8xf32> to vector<1x8xf32>
    %cst_86 = arith.constant dense<0.000000e+00> : vector<16x8xf32>
    %126 = tpu.matmul %24, %123, %cst_86 {dimension_numbers = #tpu.dot_dimension_numbers<[1], [0], [0], [1], [0, 0, 1, 1], [], []>} : vector<16x32xf32>, vector<32x8xf32>, vector<16x8xf32> -> vector<16x8xf32>
    %127 = vector.broadcast %125 : vector<1x8xf32> to vector<16x8xf32>
    %128 = arith.addf %126, %127 : vector<16x8xf32>
    %129 = vector.shape_cast %128 : vector<16x8xf32> to vector<2x8x8xf32>
    "tpu.trace_start"() <{level = 10 : i32, message = "bqd,bkd->bqk"}> : () -> ()
    %cst_87 = arith.constant dense<0.000000e+00> : vector<2x8x8xf32>
    %130 = tpu.matmul %113, %121, %cst_87 {dimension_numbers = #tpu.dot_dimension_numbers<[2], [2], [1], [1], [0, 0, 0, 1, 1, 1], [0], [0]>} : vector<2x8x8xf32>, vector<2x8x8xf32>, vector<2x8x8xf32> -> vector<2x8x8xf32>
    "tpu.trace_stop"() : () -> ()
    %cst_88 = arith.constant dense<0xFF800000> : vector<2x8xf32>
    %131 = vector.multi_reduction <maximumf>, %130, %cst_88 [2] : vector<2x8x8xf32> to vector<2x8xf32>
    %132 = vector.shape_cast %131 : vector<2x8xf32> to vector<2x8x1xf32>
    %133 = vector.broadcast %132 : vector<2x8x1xf32> to vector<2x8x8xf32>
    %134 = arith.subf %130, %133 : vector<2x8x8xf32>
    %135 = math.exp %134 : vector<2x8x8xf32>
    %cst_89 = arith.constant dense<0.000000e+00> : vector<2x8xf32>
    %136 = vector.multi_reduction <add>, %135, %cst_89 [2] : vector<2x8x8xf32> to vector<2x8xf32>
    %137 = vector.shape_cast %136 : vector<2x8xf32> to vector<2x8x1xf32>
    %138 = vector.broadcast %137 : vector<2x8x1xf32> to vector<2x8x8xf32>
    %139 = arith.divf %135, %138 : vector<2x8x8xf32>
    "tpu.trace_start"() <{level = 10 : i32, message = "bqk,bkd->bqd"}> : () -> ()
    %cst_90 = arith.constant dense<0.000000e+00> : vector<2x8x8xf32>
    %140 = tpu.matmul %139, %129, %cst_90 {dimension_numbers = #tpu.dot_dimension_numbers<[2], [1], [1], [2], [0, 0, 0, 1, 1, 2], [0], [0]>} : vector<2x8x8xf32>, vector<2x8x8xf32>, vector<2x8x8xf32> -> vector<2x8x8xf32>
    "tpu.trace_stop"() : () -> ()
    %141 = vector.shape_cast %140 : vector<2x8x8xf32> to vector<16x8xf32>
    %c2_91 = arith.constant 2 : index
    %c0_92 = arith.constant 0 : index
    %c0_93 = arith.constant 0 : index
    %142 = vector.load %arg9[%c2_91, %c0_92, %c0_93] : memref<4x8x32xf32, #tpu.memory_space<vmem>>, vector<1x8x32xf32>
    %143 = vector.shape_cast %142 : vector<1x8x32xf32> to vector<8x32xf32>
    %cst_94 = arith.constant dense<0.000000e+00> : vector<16x32xf32>
    %144 = tpu.matmul %141, %143, %cst_94 {dimension_numbers = #tpu.dot_dimension_numbers<[1], [0], [0], [1], [0, 0, 1, 1], [], []>} : vector<16x8xf32>, vector<8x32xf32>, vector<16x32xf32> -> vector<16x32xf32>
    %145 = arith.addf %105, %144 : vector<16x32xf32>
    %c3 = arith.constant 3 : index
    %c0_95 = arith.constant 0 : index
    %c0_96 = arith.constant 0 : index
    %146 = vector.load %arg3[%c3, %c0_95, %c0_96] : memref<4x32x8xf32, #tpu.memory_space<vmem>>, vector<1x32x8xf32>
    %147 = vector.shape_cast %146 : vector<1x32x8xf32> to vector<32x8xf32>
    %c3_97 = arith.constant 3 : index
    %c0_98 = arith.constant 0 : index
    %c0_99 = arith.constant 0 : index
    %148 = vector.load %arg6[%c3_97, %c0_98, %c0_99] : memref<4x1x8xf32, #tpu.memory_space<vmem>>, vector<1x1x8xf32>
    %149 = vector.shape_cast %148 : vector<1x1x8xf32> to vector<1x8xf32>
    %cst_100 = arith.constant dense<0.000000e+00> : vector<16x8xf32>
    %150 = tpu.matmul %24, %147, %cst_100 {dimension_numbers = #tpu.dot_dimension_numbers<[1], [0], [0], [1], [0, 0, 1, 1], [], []>} : vector<16x32xf32>, vector<32x8xf32>, vector<16x8xf32> -> vector<16x8xf32>
    %151 = vector.broadcast %149 : vector<1x8xf32> to vector<16x8xf32>
    %152 = arith.addf %150, %151 : vector<16x8xf32>
    %153 = vector.shape_cast %152 : vector<16x8xf32> to vector<2x8x8xf32>
    %c3_101 = arith.constant 3 : index
    %c0_102 = arith.constant 0 : index
    %c0_103 = arith.constant 0 : index
    %154 = vector.load %arg4[%c3_101, %c0_102, %c0_103] : memref<4x32x8xf32, #tpu.memory_space<vmem>>, vector<1x32x8xf32>
    %155 = vector.shape_cast %154 : vector<1x32x8xf32> to vector<32x8xf32>
    %c3_104 = arith.constant 3 : index
    %c0_105 = arith.constant 0 : index
    %c0_106 = arith.constant 0 : index
    %156 = vector.load %arg7[%c3_104, %c0_105, %c0_106] : memref<4x1x8xf32, #tpu.memory_space<vmem>>, vector<1x1x8xf32>
    %157 = vector.shape_cast %156 : vector<1x1x8xf32> to vector<1x8xf32>
    %cst_107 = arith.constant dense<0.000000e+00> : vector<16x8xf32>
    %158 = tpu.matmul %24, %155, %cst_107 {dimension_numbers = #tpu.dot_dimension_numbers<[1], [0], [0], [1], [0, 0, 1, 1], [], []>} : vector<16x32xf32>, vector<32x8xf32>, vector<16x8xf32> -> vector<16x8xf32>
    %159 = vector.broadcast %157 : vector<1x8xf32> to vector<16x8xf32>
    %160 = arith.addf %158, %159 : vector<16x8xf32>
    %161 = vector.shape_cast %160 : vector<16x8xf32> to vector<2x8x8xf32>
    %c3_108 = arith.constant 3 : index
    %c0_109 = arith.constant 0 : index
    %c0_110 = arith.constant 0 : index
    %162 = vector.load %arg5[%c3_108, %c0_109, %c0_110] : memref<4x32x8xf32, #tpu.memory_space<vmem>>, vector<1x32x8xf32>
    %163 = vector.shape_cast %162 : vector<1x32x8xf32> to vector<32x8xf32>
    %c3_111 = arith.constant 3 : index
    %c0_112 = arith.constant 0 : index
    %c0_113 = arith.constant 0 : index
    %164 = vector.load %arg8[%c3_111, %c0_112, %c0_113] : memref<4x1x8xf32, #tpu.memory_space<vmem>>, vector<1x1x8xf32>
    %165 = vector.shape_cast %164 : vector<1x1x8xf32> to vector<1x8xf32>
    %cst_114 = arith.constant dense<0.000000e+00> : vector<16x8xf32>
    %166 = tpu.matmul %24, %163, %cst_114 {dimension_numbers = #tpu.dot_dimension_numbers<[1], [0], [0], [1], [0, 0, 1, 1], [], []>} : vector<16x32xf32>, vector<32x8xf32>, vector<16x8xf32> -> vector<16x8xf32>
    %167 = vector.broadcast %165 : vector<1x8xf32> to vector<16x8xf32>
    %168 = arith.addf %166, %167 : vector<16x8xf32>
    %169 = vector.shape_cast %168 : vector<16x8xf32> to vector<2x8x8xf32>
    "tpu.trace_start"() <{level = 10 : i32, message = "bqd,bkd->bqk"}> : () -> ()
    %cst_115 = arith.constant dense<0.000000e+00> : vector<2x8x8xf32>
    %170 = tpu.matmul %153, %161, %cst_115 {dimension_numbers = #tpu.dot_dimension_numbers<[2], [2], [1], [1], [0, 0, 0, 1, 1, 1], [0], [0]>} : vector<2x8x8xf32>, vector<2x8x8xf32>, vector<2x8x8xf32> -> vector<2x8x8xf32>
    "tpu.trace_stop"() : () -> ()
    %cst_116 = arith.constant dense<0xFF800000> : vector<2x8xf32>
    %171 = vector.multi_reduction <maximumf>, %170, %cst_116 [2] : vector<2x8x8xf32> to vector<2x8xf32>
    %172 = vector.shape_cast %171 : vector<2x8xf32> to vector<2x8x1xf32>
    %173 = vector.broadcast %172 : vector<2x8x1xf32> to vector<2x8x8xf32>
    %174 = arith.subf %170, %173 : vector<2x8x8xf32>
    %175 = math.exp %174 : vector<2x8x8xf32>
    %cst_117 = arith.constant dense<0.000000e+00> : vector<2x8xf32>
    %176 = vector.multi_reduction <add>, %175, %cst_117 [2] : vector<2x8x8xf32> to vector<2x8xf32>
    %177 = vector.shape_cast %176 : vector<2x8xf32> to vector<2x8x1xf32>
    %178 = vector.broadcast %177 : vector<2x8x1xf32> to vector<2x8x8xf32>
    %179 = arith.divf %175, %178 : vector<2x8x8xf32>
    "tpu.trace_start"() <{level = 10 : i32, message = "bqk,bkd->bqd"}> : () -> ()
    %cst_118 = arith.constant dense<0.000000e+00> : vector<2x8x8xf32>
    %180 = tpu.matmul %179, %169, %cst_118 {dimension_numbers = #tpu.dot_dimension_numbers<[2], [1], [1], [2], [0, 0, 0, 1, 1, 2], [0], [0]>} : vector<2x8x8xf32>, vector<2x8x8xf32>, vector<2x8x8xf32> -> vector<2x8x8xf32>
    "tpu.trace_stop"() : () -> ()
    %181 = vector.shape_cast %180 : vector<2x8x8xf32> to vector<16x8xf32>
    %c3_119 = arith.constant 3 : index
    %c0_120 = arith.constant 0 : index
    %c0_121 = arith.constant 0 : index
    %182 = vector.load %arg9[%c3_119, %c0_120, %c0_121] : memref<4x8x32xf32, #tpu.memory_space<vmem>>, vector<1x8x32xf32>
    %183 = vector.shape_cast %182 : vector<1x8x32xf32> to vector<8x32xf32>
    %cst_122 = arith.constant dense<0.000000e+00> : vector<16x32xf32>
    %184 = tpu.matmul %181, %183, %cst_122 {dimension_numbers = #tpu.dot_dimension_numbers<[1], [0], [0], [1], [0, 0, 1, 1], [], []>} : vector<16x8xf32>, vector<8x32xf32>, vector<16x32xf32> -> vector<16x32xf32>
    %185 = arith.addf %145, %184 : vector<16x32xf32>
    %186 = arith.addf %0, %185 : vector<16x32xf32>
    %c0_123 = arith.constant 0 : index
    %c0_124 = arith.constant 0 : index
    %187 = vector.load %arg10[%c0_123, %c0_124] : memref<1x32xf32, #tpu.memory_space<vmem>>, vector<1x32xf32>
    %188 = vector.broadcast %187 : vector<1x32xf32> to vector<16x32xf32>
    %189 = arith.addf %186, %188 : vector<16x32xf32>
    %cst_125 = arith.constant dense<0.000000e+00> : vector<16xf32>
    %190 = vector.multi_reduction <add>, %189, %cst_125 [1] : vector<16x32xf32> to vector<16xf32>
    %191 = vector.shape_cast %190 : vector<16xf32> to vector<16x1xf32>
    %cst_126 = arith.constant 3.200000e+01 : f32
    %192 = vector.broadcast %cst_126 : f32 to vector<16x1xf32>
    %193 = arith.divf %191, %192 : vector<16x1xf32>
    %194 = vector.broadcast %193 : vector<16x1xf32> to vector<16x32xf32>
    %195 = arith.subf %189, %194 : vector<16x32xf32>
    %196 = arith.mulf %195, %195 : vector<16x32xf32>
    %cst_127 = arith.constant dense<0.000000e+00> : vector<16xf32>
    %197 = vector.multi_reduction <add>, %196, %cst_127 [1] : vector<16x32xf32> to vector<16xf32>
    %198 = vector.shape_cast %197 : vector<16xf32> to vector<16x1xf32>
    %cst_128 = arith.constant 3.200000e+01 : f32
    %199 = vector.broadcast %cst_128 : f32 to vector<16x1xf32>
    %200 = arith.divf %198, %199 : vector<16x1xf32>
    %201 = vector.broadcast %193 : vector<16x1xf32> to vector<16x32xf32>
    %202 = arith.subf %189, %201 : vector<16x32xf32>
    %cst_129 = arith.constant 9.99999974E-6 : f32
    %203 = vector.broadcast %cst_129 : f32 to vector<16x1xf32>
    %204 = arith.addf %200, %203 : vector<16x1xf32>
    %205 = math.rsqrt %204 : vector<16x1xf32>
    %206 = vector.broadcast %205 : vector<16x1xf32> to vector<16x32xf32>
    %207 = arith.mulf %202, %206 : vector<16x32xf32>
    %c0_130 = arith.constant 0 : index
    %c0_131 = arith.constant 0 : index
    %208 = vector.load %arg11[%c0_130, %c0_131] : memref<1x32xf32, #tpu.memory_space<vmem>>, vector<1x32xf32>
    %209 = vector.broadcast %208 : vector<1x32xf32> to vector<16x32xf32>
    %210 = arith.mulf %207, %209 : vector<16x32xf32>
    %c0_132 = arith.constant 0 : index
    %c0_133 = arith.constant 0 : index
    %211 = vector.load %arg12[%c0_132, %c0_133] : memref<1x32xf32, #tpu.memory_space<vmem>>, vector<1x32xf32>
    %212 = vector.broadcast %211 : vector<1x32xf32> to vector<16x32xf32>
    %213 = arith.addf %210, %212 : vector<16x32xf32>
    %c0_134 = arith.constant 0 : index
    %c0_135 = arith.constant 0 : index
    %214 = vector.load %arg13[%c0_134, %c0_135] : memref<32x128xf32, #tpu.memory_space<vmem>>, vector<32x128xf32>
    %c0_136 = arith.constant 0 : index
    %c0_137 = arith.constant 0 : index
    %215 = vector.load %arg14[%c0_136, %c0_137] : memref<1x128xf32, #tpu.memory_space<vmem>>, vector<1x128xf32>
    %cst_138 = arith.constant dense<0.000000e+00> : vector<16x128xf32>
    %216 = tpu.matmul %213, %214, %cst_138 {dimension_numbers = #tpu.dot_dimension_numbers<[1], [0], [0], [1], [0, 0, 1, 1], [], []>} : vector<16x32xf32>, vector<32x128xf32>, vector<16x128xf32> -> vector<16x128xf32>
    %217 = vector.broadcast %215 : vector<1x128xf32> to vector<16x128xf32>
    %218 = arith.addf %216, %217 : vector<16x128xf32>
    %cst_139 = arith.constant 5.000000e-01 : f32
    %219 = vector.broadcast %cst_139 : f32 to vector<16x128xf32>
    %220 = arith.mulf %219, %218 : vector<16x128xf32>
    %cst_140 = arith.constant 0.707106769 : f32
    %221 = vector.broadcast %cst_140 : f32 to vector<16x128xf32>
    %222 = arith.mulf %218, %221 : vector<16x128xf32>
    %223 = math.erf %222 : vector<16x128xf32>
    %cst_141 = arith.constant 1.000000e+00 : f32
    %224 = vector.broadcast %cst_141 : f32 to vector<16x128xf32>
    %225 = arith.addf %224, %223 : vector<16x128xf32>
    %226 = arith.mulf %220, %225 : vector<16x128xf32>
    %c0_142 = arith.constant 0 : index
    %c0_143 = arith.constant 0 : index
    %227 = vector.load %arg15[%c0_142, %c0_143] : memref<128x32xf32, #tpu.memory_space<vmem>>, vector<128x32xf32>
    %c0_144 = arith.constant 0 : index
    %c0_145 = arith.constant 0 : index
    %228 = vector.load %arg16[%c0_144, %c0_145] : memref<1x32xf32, #tpu.memory_space<vmem>>, vector<1x32xf32>
    %cst_146 = arith.constant dense<0.000000e+00> : vector<16x32xf32>
    %229 = tpu.matmul %226, %227, %cst_146 {dimension_numbers = #tpu.dot_dimension_numbers<[1], [0], [0], [1], [0, 0, 1, 1], [], []>} : vector<16x128xf32>, vector<128x32xf32>, vector<16x32xf32> -> vector<16x32xf32>
    %230 = vector.broadcast %228 : vector<1x32xf32> to vector<16x32xf32>
    %231 = arith.addf %229, %230 : vector<16x32xf32>
    %232 = arith.addf %189, %231 : vector<16x32xf32>
    %c0_147 = arith.constant 0 : index
    %c0_148 = arith.constant 0 : index
    %233 = vector.load %arg19[%c0_147, %c0_148] : memref<16x32xf32, #tpu.memory_space<vmem>>, vector<16x32xf32>
    tpu.vector_store %arg19[%c0_147, %c0_148], %232 {strides = array<i32>} : memref<16x32xf32, #tpu.memory_space<vmem>>, vector<16x32xf32>,
    %234 = vector.shape_cast %232 : vector<16x32xf32> to vector<2x8x32xf32>
    %cst_149 = arith.constant dense<0.000000e+00> : vector<2x32xf32>
    %235 = vector.multi_reduction <add>, %234, %cst_149 [1] : vector<2x8x32xf32> to vector<2x32xf32>
    %cst_150 = arith.constant 8.000000e+00 : f32
    %236 = vector.broadcast %cst_150 : f32 to vector<2x32xf32>
    %237 = arith.divf %235, %236 : vector<2x32xf32>
    %c0_151 = arith.constant 0 : index
    %c0_152 = arith.constant 0 : index
    %238 = vector.load %arg17[%c0_151, %c0_152] : memref<32x32xf32, #tpu.memory_space<vmem>>, vector<32x32xf32>
    %c0_153 = arith.constant 0 : index
    %c0_154 = arith.constant 0 : index
    %239 = vector.load %arg18[%c0_153, %c0_154] : memref<1x32xf32, #tpu.memory_space<vmem>>, vector<1x32xf32>
    %cst_155 = arith.constant dense<0.000000e+00> : vector<2x32xf32>
    %240 = tpu.matmul %237, %238, %cst_155 {dimension_numbers = #tpu.dot_dimension_numbers<[1], [0], [0], [1], [0, 0, 1, 1], [], []>} : vector<2x32xf32>, vector<32x32xf32>, vector<2x32xf32> -> vector<2x32xf32>
    %241 = vector.broadcast %239 : vector<1x32xf32> to vector<2x32xf32>
    %242 = arith.addf %240, %241 : vector<2x32xf32>
    %c0_156 = arith.constant 0 : index
    %c0_157 = arith.constant 0 : index
    %243 = vector.load %arg20[%c0_156, %c0_157] : memref<2x32xf32, #tpu.memory_space<vmem>>, vector<2x32xf32>
    tpu.vector_store %arg20[%c0_156, %c0_157], %242 {strides = array<i32>} : memref<2x32xf32, #tpu.memory_space<vmem>>, vector<2x32xf32>,
    return
  }
}

</mosaic_0001>

<bundles_post_ra>
// kernel: tpu_custom_call.1
= control target key start
LH: loop header
LB: loop body
LE: loop exit
PB: predicated region body
PF: predicated region fallthrough
CT: control target
= control target key end

     0   :  { %s4457_s0 = inlined_call_operand.vmem [shape: f32[16,32], index: 0, kind: input, shape index: {}]   ;;  %s4458_s1 = inlined_call_operand.vmem [shape: f32[1,32], index: 1, kind: input, shape index: {}]   ;;  %s4459_s2 = inlined_call_operand.vmem [shape: f32[1,32], index: 2, kind: input, shape index: {}]   ;;  %s4460_s3 = inlined_call_operand.vmem [shape: f32[4,32,8], index: 3, kind: input, shape index: {}]   ;;  %s4461_s4 = inlined_call_operand.vmem [shape: f32[4,32,8], index: 4, kind: input, shape index: {}]   ;;  %s4462_s5 = inlined_call_operand.vmem [shape: f32[4,32,8], index: 5, kind: input, shape index: {}]   ;;  %s4463_s6 = inlined_call_operand.vmem [shape: f32[4,1,8], index: 6, kind: input, shape index: {}]   ;;  %s4464_s7 = inlined_call_operand.vmem [shape: f32[4,1,8], index: 7, kind: input, shape index: {}]   ;;  %s4465_s8 = inlined_call_operand.vmem [shape: f32[4,1,8], index: 8, kind: input, shape index: {}]   ;;  %s4466_s9 = inlined_call_operand.vmem [shape: f32[4,8,32], index: 9, kind: input, shape index: {}]   ;;  %s4467_s10 = inlined_call_operand.vmem [shape: f32[1,32], index: 10, kind: input, shape index: {}]   ;;  %s4468_s11 = inlined_call_operand.vmem [shape: f32[1,32], index: 11, kind: input, shape index: {}]   ;;  %s4469_s12 = inlined_call_operand.vmem [shape: f32[1,32], index: 12, kind: input, shape index: {}]   ;;  %s4470_s13 = inlined_call_operand.vmem [shape: f32[32,128], index: 13, kind: input, shape index: {}]   ;;  %s4471_s14 = inlined_call_operand.vmem [shape: f32[1,128], index: 14, kind: input, shape index: {}]   ;;  %s4472_s15 = inlined_call_operand.vmem [shape: f32[128,32], index: 15, kind: input, shape index: {}]   ;;  %s4473_s16 = inlined_call_operand.vmem [shape: f32[1,32], index: 16, kind: input, shape index: {}]   ;;  %s4474_s17 = inlined_call_operand.vmem [shape: f32[32,32], index: 17, kind: input, shape index: {}]   ;;  %s4475_s18 = inlined_call_operand.vmem [shape: f32[1,32], index: 18, kind: input, shape index: {}]   ;;  %s4476_s19 = inlined_call_operand.hbm [shape: f32[16,32], index: 19, kind: output, shape index: {0}]   ;;  %s4477_s20 = inlined_call_operand.hbm [shape: f32[2,32], index: 20, kind: output, shape index: {1}]  }
   0x1   :  { %4481 = sst [smem:[#allocation8_spill]] %s4457_s0 }
   0x2   :  { %4482 = sst [smem:[#allocation9_spill]] %s4458_s1 }
   0x3   :  { %4483 = sst [smem:[#allocation10_spill]] %s4459_s2 }
   0x4   :  { %4484 = sst [smem:[#allocation11_spill]] %s4460_s3 }
   0x5   :  { %4485 = sst [smem:[#allocation12_spill]] %s4461_s4 }
   0x6   :  { %26 = vsyncpa [#allocation3], 0  ;;  %s4486_s23 = sld [smem:[#allocation8_spill]]  ;;  %vm68_vm0 = vcmask 261120  }
   0xc   :  { %v3950_v0 = vld [vmem:[%s4486_s23] sm:$0xff]  ;;  %v3955_v1 = vld [vmem:[%s4486_s23 + $0x8] sm:$0xff] }
   0xd   :  { %27 = vsyncpa [#allocation5], 0  ;;  %v69_v2 = vsel %vm68_vm0, %v3950_v0, 0.0  ;;  %v72_v3 = vsel %vm68_vm0, %v3955_v1, 0.0  ;;  %s4487_s26 = sld [smem:[#allocation11_spill]]  ;;  %v295_v38 = vld [vmem:[%s4462_s5 + $0x18] sm:$0xff] }
   0xe   :  { %70 = vadd.xlane.f32.xlu0 %v69_v2  ;;  %s4488_s22 = sld [smem:[#allocation12_spill]]  ;;  %v294_v39 = vld [vmem:[%s4462_s5 + $0x10] sm:$0xff]  ;;  %v293_v40 = vld [vmem:[%s4462_s5 + $0x8] sm:$0xff]  ;;  %v292_v41 = vld [vmem:[%s4462_s5] sm:$0xff]  ;;  %v3836_v42 = vmov 0.0   ;;  %vm3837_vm1 = vmmov 0  }
   0xf   :  { %s4489_s2 = sld [smem:[#allocation9_spill]]  ;;  %3486 = vmatprep.subr.mxu1 %v3836_v42  ;;  %3488 = vmatprep.mubr.msk.f32.mxu1 %vm3837_vm1, %v3836_v42  ;;  %v3186_v46 = vld [vmem:[%s4464_s7] ss:$0 sm:$0xff]  ;;  %vm378_vm2 = vcmask 64512   ;;  %vm3075_vm3 = vcmask 1041409  }
  0x10   :  { %s4490_s27 = sld [smem:[#allocation10_spill]]  ;;  %v3183_v49 = vld [vmem:[%s4463_s6] ss:$0 sm:$0xff] }
  0x11   :  { %v3189_v53 = vld [vmem:[%s4465_s8] ss:$0 sm:$0xff] }
  0x12   :  { %73 = vadd.xlane.f32.xlu0 %v72_v3 }
  0x13   :  { %v117_v14 = vld [vmem:[%s4487_s26 + $0x18] sm:$0xff]  ;;  %v116_v15 = vld [vmem:[%s4487_s26 + $0x10] sm:$0xff]  ;;  %v115_v16 = vld [vmem:[%s4487_s26 + $0x8] sm:$0xff] }
  0x14   :  { %3453 = vmatprep.subr.mxu0 %v117_v14  ;;  %v114_v17 = vld [vmem:[%s4487_s26] sm:$0xff]  ;;  %v209_v18 = vld [vmem:[%s4488_s22 + $0x18] sm:$0xff]  ;;  %v208_v35 = vld [vmem:[%s4488_s22 + $0x10] sm:$0xff] }
  0x15   :  { %3454 = vmatpush3.msra.mxu0 %v117_v14  ;;  %v3181_v26 = vld [vmem:[%s4489_s2] ss:$0 sm:$0xff]  ;;  %v207_v36 = vld [vmem:[%s4488_s22 + $0x8] sm:$0xff] }
  0x16   :  { %3455 = vmatprep.subr.mxu0 %v116_v15  ;;  %v3182_v28 = vld [vmem:[%s4490_s27] ss:$0 sm:$0xff] }
  0x17   :  { %3456 = vmatpush3.msra.mxu0 %v116_v15  ;;  %v206_v37 = vld [vmem:[%s4488_s22] sm:$0xff] }
  0x18   :  { %3457 = vmatprep.subr.mxu0 %v115_v16 }
  0x19   :  { %3458 = vmatpush3.msra.mxu0 %v115_v16 }
  0x1a   :  { %3459 = vmatprep.subr.mxu0 %v114_v17 }
  0x1b   :  { %3460 = vmatpush3.msra.mxu0 %v114_v17 }
  0x1c   :  { %3464 = vmatprep.subr.mxu0 %v209_v18 }
  0x97   :  { %v71_v4 = vpop.xlane.xlu0 %70 }
  0x98   :  { %v76_v5 = vmul.f32 0.03125, %v71_v4 }
  0x9a   :  { %v78_v6 = vsub.f32 %v3950_v0, %v76_v5 }
  0x9b   :  { %v74_v7 = vpop.xlane.xlu0 %73 }
  0x9c   :  { %v77_v8 = vmul.f32 0.03125, %v74_v7  ;;  %v80_v9 = vmul.f32 %v78_v6, %v78_v6 }
  0x9e   :  { %v79_v10 = vsub.f32 %v3955_v1, %v77_v8  ;;  %v82_v11 = vsel %vm68_vm0, %v80_v9, 0.0 }
  0x9f   :  { %83 = vadd.xlane.f32.xlu1 %v82_v11 }
  0xa0   :  { %v81_v12 = vmul.f32 %v79_v10, %v79_v10 }
  0xa2   :  { %v85_v13 = vsel %vm68_vm0, %v81_v12, 0.0  ;;  %v3201_v12 = vld [vmem:[%s4487_s26 + $0x38] sm:$0xff] }
  0xa3   :  { %86 = vadd.xlane.f32.xlu1 %v85_v13  ;;  %v3209_v13 = vld [vmem:[%s4488_s22 + $0x38] sm:$0xff] }
 0x128   :  { %v84_v19 = vpop.xlane.xlu1 %83 }
 0x129   :  { %v88_v20 = vmul.f32 0.03125, %v84_v19 }
 0x12b   :  { %v90_v21 = vadd.f32 1e-05, %v88_v20  ;;  %v3199_v20 = vld [vmem:[%s4487_s26 + $0x28] sm:$0xff] }
 0x12c   :  { %v87_v22 = vpop.xlane.xlu1 %86 }
 0x12d   :  { %3748 = vrsqrt.f32 %v90_v21  ;;  %v89_v23 = vmul.f32 0.03125, %v87_v22  ;;  %v3198_v22 = vld [vmem:[%s4487_s26 + $0x20] sm:$0xff] }
 0x12f   :  { %v91_v24 = vadd.f32 1e-05, %v89_v23  ;;  %v3208_v23 = vld [vmem:[%s4488_s22 + $0x30] sm:$0xff] }
 0x131   :  { %3750 = vrsqrt.f32 %v91_v24  ;;  %v3207_v24 = vld [vmem:[%s4488_s22 + $0x28] sm:$0xff] }
 0x13a   :  { %v3749_v25 = vpop.eup %3748 }
 0x13b   :  { %v94_v27 = vmul.f32 %v3749_v25, %v78_v6  ;;  %v3217_v25 = vld [vmem:[%s4462_s5 + $0x38] sm:$0xff] }
 0x13d   :  { %v103_v29 = vmul.f32 %v3181_v26, %v94_v27  ;;  %v3216_v27 = vld [vmem:[%s4462_s5 + $0x30] sm:$0xff] }
 0x13e   :  { %v3751_v30 = vpop.eup %3750 }
 0x13f   :  { %v3986_v31 = vadd.f32 %v3182_v28, %v103_v29  ;;  %v95_v32 = vmul.f32 %v3751_v30, %v79_v10  ;;  %v3214_v29 = vld [vmem:[%s4462_s5 + $0x20] sm:$0xff] }
 0x141   :  { %v104_v33 = vmul.f32 %v3181_v26, %v95_v32  ;;  %3461 = vmatprep.mubr.msk.f32.mxu0 %vm68_vm0, %v3986_v31  ;;  %v3206_v26 = vld [vmem:[%s4488_s22 + $0x20] sm:$0xff] }
 0x143   :  { %v3990_v34 = vadd.f32 %v3182_v28, %v104_v33  ;;  %v3215_v28 = vld [vmem:[%s4462_s5 + $0x28] sm:$0xff] }
 0x145   :  { %3462 = vmatmul.mubr.msk.f32.vlgmr.msra.gmra.mxu0 %vm68_vm0, %v3990_v34 }
 0x146   :  { %3465 = vmatpush3.msra.mxu0 %v209_v18  ;;  %3472 = vmatprep.mubr.msk.f32.mxu0 %vm68_vm0, %v3986_v31  ;;  %v3200_v18 = vld [vmem:[%s4487_s26 + $0x30] sm:$0xff] }
 0x147   :  { %3466 = vmatprep.subr.mxu0 %v208_v35 }
 0x148   :  { %3467 = vmatpush3.msra.mxu0 %v208_v35 }
 0x149   :  { %3468 = vmatprep.subr.mxu0 %v207_v36 }
 0x14a   :  { %3469 = vmatpush3.msra.mxu0 %v207_v36 }
 0x14b   :  { %3470 = vmatprep.subr.mxu0 %v206_v37 }
 0x14c   :  { %3471 = vmatpush3.msra.mxu0 %v206_v37 }
 0x14d   :  { %3473 = vmatmul.mubr.msk.f32.vlgmr.msra.gmra.mxu0 %vm68_vm0, %v3990_v34  ;;  %3475 = vmatprep.subr.mxu0 %v295_v38 }
 0x14e   :  { %3476 = vmatpush3.msra.mxu0 %v295_v38  ;;  %3483 = vmatprep.mubr.msk.f32.mxu0 %vm68_vm0, %v3986_v31  ;;  %v3211_v38 = vld [vmem:[%s4464_s7 + $0x1] ss:$0 sm:$0xff] }
 0x14f   :  { %3477 = vmatprep.subr.mxu0 %v294_v39 }
 0x150   :  { %3478 = vmatpush3.msra.mxu0 %v294_v39 }
 0x151   :  { %3479 = vmatprep.subr.mxu0 %v293_v40 }
 0x152   :  { %3480 = vmatpush3.msra.mxu0 %v293_v40 }
 0x153   :  { %3481 = vmatprep.subr.mxu0 %v292_v41 }
 0x154   :  { %3482 = vmatpush3.msra.mxu0 %v292_v41 }
 0x155   :  { %3484 = vmatmul.mubr.msk.f32.vlgmr.msra.gmra.mxu0 %vm68_vm0, %v3990_v34  ;;  %3496 = vmatprep.subr.mxu0 %v3836_v42 }
 0x156   :  { %3498 = vmatprep.mubr.msk.f32.mxu0 %vm3837_vm1, %v3836_v42 }
 0x205   :  { %v3463_v43 = vpop.f32.mrf.mxu0 }
 0x206   :  { %v203_v54 = vadd.f32 %v3463_v43, %v3183_v49  ;;  %v3203_v43 = vld [vmem:[%s4463_s6 + $0x1] ss:$0 sm:$0xff] }
 0x207   :  { %v197_v44 = vpop.f32.mrf.mxu0 }
 0x208   :  { %v198_v50 = vadd.f32 %v3183_v49, %v197_v44 }
 0x20d   :  { %v3474_v45 = vpop.f32.mrf.mxu0 }
 0x20e   :  { %v289_v51 = vadd.f32 %v3474_v45, %v3186_v46 }
 0x20f   :  { %v283_v47 = vpop.f32.mrf.mxu0 }
 0x210   :  { %v284_v48 = vadd.f32 %v3186_v46, %v283_v47  ;;  %v3219_v47 = vld [vmem:[%s4465_s8 + $0x1] ss:$0 sm:$0xff] }
 0x212   :  { %3487 = vmatpush3.xpose.msk.msra.mxu1 %vm378_vm2, %v284_v48 }
 0x213   :  { %3491 = vmatprep.subr.mxu1 %v3836_v42 }
 0x215   :  { %v3485_v52 = vpop.f32.mrf.mxu0  ;;  %3489 = vmatmul.mubr.msk.f32.vlgmr.msra.gmra.mxu1 %vm378_vm2, %v198_v50 }
 0x216   :  { %3492 = vmatpush3.xpose.msk.msra.mxu1 %vm378_vm2, %v289_v51  ;;  %3493 = vmatprep.mubr.msk.f32.mxu1 %vm3837_vm1, %v3836_v42  ;;  %v375_v56 = vadd.f32 %v3485_v52, %v3189_v53 }
 0x217   :  { %v369_v55 = vpop.f32.mrf.mxu0  ;;  %3501 = vmatprep.subr.mxu1 %v3836_v42 }
 0x218   :  { %v370_v57 = vadd.f32 %v3189_v53, %v369_v55 }
 0x219   :  { %3494 = vmatmul.mubr.msk.f32.vlgmr.msra.gmra.mxu1 %vm378_vm2, %v203_v54 }
 0x21a   :  { %3497 = vmatpush3.msra.mxu0 %v370_v57  ;;  %3502 = vmatpush3.msra.mxu1 %v375_v56 }
 0x21b   :  { %3503 = vmatprep.mubr.msk.f32.mxu1 %vm3837_vm1, %v3836_v42  ;;  %3506 = vmatprep.subr.mxu0 %v3201_v12 }
 0x21c   :  { %3517 = vmatprep.subr.mxu1 %v3209_v13 }
 0x2d5   :  { %v451_v58 = vpop.f32.mrf.mxu1 }
 0x2d6   :  { %v531_v59 = vsel %vm378_vm2, %v451_v58, -inf }
 0x2d7   :  { %532 = vmax.xlane.f32.xlu1 %v531_v59  ;;  %v3490_v60 = vpop.f32.mrf.mxu1 }
 0x2d9   :  { %v527_v61 = vpop.f32.mrf.mxu1 }
 0x2da   :  { %v534_v62 = vsel %vm378_vm2, %v527_v61, -inf }
 0x2db   :  { %535 = vmax.xlane.f32.xlu0 %v534_v62  ;;  %v3495_v63 = vpop.f32.mrf.mxu1 }
 0x360   :  { %v533_v2 = vpop.xlane.xlu1 %532 }
 0x361   :  { %v537_v3 = vsub.f32 %v451_v58, %v533_v2 }
 0x363   :  { %v539_v4 = vmul.f32 1.442695, %v537_v3 }
 0x364   :  { %v536_v5 = vpop.xlane.xlu0 %535 }
 0x365   :  { %3752 = vpow2.f32 %v539_v4  ;;  %v538_v6 = vsub.f32 %v527_v61, %v536_v5 }
 0x367   :  { %v541_v7 = vmul.f32 1.442695, %v538_v6  ;;  %v699_v6 = vld [vmem:[%s4466_s9] sm:$0xff] }
 0x369   :  { %3754 = vpow2.f32 %v541_v7 }
 0x372   :  { %v3753_v8 = vpop.eup %3752 }
 0x373   :  { %v543_v9 = vsel %vm378_vm2, %v3753_v8, 0.0 }
 0x374   :  { %544 = vadd.xlane.f32.xlu1 %v543_v9 }
 0x376   :  { %v3755_v10 = vpop.eup %3754 }
 0x377   :  { %v546_v11 = vsel %vm378_vm2, %v3755_v10, 0.0 }
 0x378   :  { %547 = vadd.xlane.f32.xlu0 %v546_v11 }
 0x3fd   :  { %v545_v14 = vpop.xlane.xlu1 %544 }
 0x3fe   :  { %3756 = vrcp.f32 %v545_v14  ;;  %v3243_v14 = vld [vmem:[%s4488_s22 + $0x50] sm:$0xff] }
 0x401   :  { %v548_v15 = vpop.xlane.xlu0 %547 }
 0x402   :  { %3758 = vrcp.f32 %v548_v15  ;;  %v3242_v15 = vld [vmem:[%s4488_s22 + $0x48] sm:$0xff] }
 0x40b   :  { %v3757_v16 = vpop.eup %3756 }
 0x40c   :  { %v550_v17 = vmul.f32 %v3757_v16, %v3753_v8  ;;  %v3241_v16 = vld [vmem:[%s4488_s22 + $0x40] sm:$0xff] }
 0x40e   :  { %3499 = vmatmul.mubr.msk.f32.vlgmr.msra.gmra.mxu0 %vm378_vm2, %v550_v17  ;;  %v3228_v17 = vld [vmem:[%s4466_s9 + $0x8] sm:$0xff] }
 0x40f   :  { %v3759_v19 = vpop.eup %3758  ;;  %3507 = vmatpush3.msra.mxu0 %v3201_v12  ;;  %3514 = vmatprep.mubr.msk.f32.mxu0 %vm68_vm0, %v3986_v31 }
 0x410   :  { %3508 = vmatprep.subr.mxu0 %v3200_v18  ;;  %v552_v21 = vmul.f32 %v3759_v19, %v3755_v10 }
 0x411   :  { %3509 = vmatpush3.msra.mxu0 %v3200_v18  ;;  %v3236_v18 = vld [vmem:[%s4487_s26 + $0x58] sm:$0xff] }
 0x412   :  { %3510 = vmatprep.subr.mxu0 %v3199_v20  ;;  %3504 = vmatmul.mubr.msk.f32.vlgmr.msra.gmra.mxu1 %vm378_vm2, %v552_v21 }
 0x413   :  { %3511 = vmatpush3.msra.mxu0 %v3199_v20  ;;  %3518 = vmatpush3.msra.mxu1 %v3209_v13  ;;  %v3244_v13 = vld [vmem:[%s4488_s22 + $0x58] sm:$0xff] }
 0x414   :  { %3512 = vmatprep.subr.mxu0 %v3198_v22  ;;  %3519 = vmatprep.subr.mxu1 %v3208_v23 }
 0x415   :  { %3525 = vmatprep.mubr.msk.f32.mxu1 %vm68_vm0, %v3986_v31  ;;  %3513 = vmatpush3.msra.mxu0 %v3198_v22  ;;  %v3235_v22 = vld [vmem:[%s4487_s26 + $0x50] sm:$0xff] }
 0x416   :  { %3520 = vmatpush3.msra.mxu1 %v3208_v23  ;;  %3515 = vmatmul.mubr.msk.f32.vlgmr.msra.gmra.mxu0 %vm68_vm0, %v3990_v34 }
 0x417   :  { %3521 = vmatprep.subr.mxu1 %v3207_v24  ;;  %3528 = vmatprep.subr.mxu0 %v3217_v25 }
 0x418   :  { %3522 = vmatpush3.msra.mxu1 %v3207_v24  ;;  %3529 = vmatpush3.msra.mxu0 %v3217_v25  ;;  %v3234_v24 = vld [vmem:[%s4487_s26 + $0x48] sm:$0xff]  ;;  %v3233_v25 = vld [vmem:[%s4487_s26 + $0x40] sm:$0xff] }
 0x419   :  { %3536 = vmatprep.mubr.msk.f32.mxu0 %vm68_vm0, %v3986_v31  ;;  %3523 = vmatprep.subr.mxu1 %v3206_v26 }
 0x41a   :  { %3530 = vmatprep.subr.mxu0 %v3216_v27  ;;  %3524 = vmatpush3.msra.mxu1 %v3206_v26 }
 0x41b   :  { %3531 = vmatpush3.msra.mxu0 %v3216_v27  ;;  %3526 = vmatmul.mubr.msk.f32.vlgmr.msra.gmra.mxu1 %vm68_vm0, %v3990_v34  ;;  %v3252_v27 = vld [vmem:[%s4462_s5 + $0x58] sm:$0xff] }
 0x41c   :  { %3532 = vmatprep.subr.mxu0 %v3215_v28  ;;  %3539 = vmatprep.subr.mxu1 %v3836_v42 }
 0x41d   :  { %3533 = vmatpush3.msra.mxu0 %v3215_v28  ;;  %3541 = vmatprep.mubr.msk.f32.mxu1 %vm3837_vm1, %v3836_v42  ;;  %v3251_v28 = vld [vmem:[%s4462_s5 + $0x50] sm:$0xff] }
 0x41e   :  { %3534 = vmatprep.subr.mxu0 %v3214_v29 }
 0x41f   :  { %3535 = vmatpush3.msra.mxu0 %v3214_v29 }
 0x420   :  { %3537 = vmatmul.mubr.msk.f32.vlgmr.msra.gmra.mxu0 %vm68_vm0, %v3990_v34  ;;  %3549 = vmatprep.subr.mxu0 %v3836_v42 }
 0x421   :  { %3551 = vmatprep.mubr.msk.f32.mxu0 %vm3837_vm1, %v3836_v42 }
 0x4ce   :  { %v4108_v30 = vpop.f32.mrf.mxu0 }
 0x4d0   :  { %v3500_v32 = vpop.f32.mrf.mxu0 }
 0x4d1   :  { %v3250_v32 = vld [vmem:[%s4462_s5 + $0x48] sm:$0xff] }
 0x4d2   :  { %v4110_v33 = vpop.f32.mrf.mxu1 }
 0x4d4   :  { %v3505_v35 = vpop.f32.mrf.mxu1 }
 0x4d5   :  { %v3249_v35 = vld [vmem:[%s4462_s5 + $0x40] sm:$0xff] }
 0x4d6   :  { %v3516_v36 = vpop.f32.mrf.mxu0 }
 0x4d7   :  { %v785_v50 = vadd.f32 %v3516_v36, %v3203_v43 }
 0x4d8   :  { %v779_v40 = vpop.f32.mrf.mxu0 }
 0x4d9   :  { %v780_v45 = vadd.f32 %v3203_v43, %v779_v40  ;;  %v3238_v43 = vld [vmem:[%s4463_s6 + $0x2] ss:$0 sm:$0xff] }
 0x4db   :  { %v3527_v37 = vpop.f32.mrf.mxu1 }
 0x4dc   :  { %v873_v46 = vadd.f32 %v3527_v37, %v3211_v38 }
 0x4dd   :  { %v867_v39 = vpop.f32.mrf.mxu1 }
 0x4de   :  { %v868_v41 = vadd.f32 %v3211_v38, %v867_v39 }
 0x4e0   :  { %v3538_v44 = vpop.f32.mrf.mxu0  ;;  %3540 = vmatpush3.xpose.msk.msra.mxu1 %vm378_vm2, %v868_v41 }
 0x4e1   :  { %3544 = vmatprep.subr.mxu1 %v3836_v42  ;;  %v961_v51 = vadd.f32 %v3538_v44, %v3219_v47 }
 0x4e2   :  { %v955_v48 = vpop.f32.mrf.mxu0 }
 0x4e3   :  { %v956_v49 = vadd.f32 %v3219_v47, %v955_v48  ;;  %3542 = vmatmul.mubr.msk.f32.vlgmr.msra.gmra.mxu1 %vm378_vm2, %v780_v45 }
 0x4e4   :  { %3545 = vmatpush3.xpose.msk.msra.mxu1 %vm378_vm2, %v873_v46  ;;  %3546 = vmatprep.mubr.msk.f32.mxu1 %vm3837_vm1, %v3836_v42  ;;  %v3254_v46 = vld [vmem:[%s4465_s8 + $0x2] ss:$0 sm:$0xff] }
 0x4e5   :  { %3550 = vmatpush3.msra.mxu0 %v956_v49  ;;  %3554 = vmatprep.subr.mxu1 %v3836_v42 }
 0x4e6   :  { %3559 = vmatprep.subr.mxu0 %v3228_v17 }
 0x4e7   :  { %3547 = vmatmul.mubr.msk.f32.vlgmr.msra.gmra.mxu1 %vm378_vm2, %v785_v50 }
 0x4e8   :  { %3555 = vmatpush3.msra.mxu1 %v961_v51  ;;  %3556 = vmatprep.mubr.msk.f32.mxu1 %vm3837_vm1, %v3836_v42 }
 0x4e9   :  { %3564 = vmatprep.subr.mxu1 %v699_v6 }
 0x5a3   :  { %v1036_v52 = vpop.f32.mrf.mxu1 }
 0x5a4   :  { %v1116_v53 = vsel %vm378_vm2, %v1036_v52, -inf }
 0x5a5   :  { %1117 = vmax.xlane.f32.xlu0 %v1116_v53  ;;  %v3543_v54 = vpop.f32.mrf.mxu1 }
 0x5a7   :  { %v1112_v55 = vpop.f32.mrf.mxu1 }
 0x5a8   :  { %v1119_v56 = vsel %vm378_vm2, %v1112_v55, -inf }
 0x5a9   :  { %1120 = vmax.xlane.f32.xlu1 %v1119_v56  ;;  %v3548_v57 = vpop.f32.mrf.mxu1 }
 0x62e   :  { %v1118_v58 = vpop.xlane.xlu0 %1117 }
 0x62f   :  { %v1122_v59 = vsub.f32 %v1036_v52, %v1118_v58 }
 0x631   :  { %v1124_v60 = vmul.f32 1.442695, %v1122_v59 }
 0x632   :  { %v1121_v61 = vpop.xlane.xlu1 %1120 }
 0x633   :  { %3760 = vpow2.f32 %v1124_v60  ;;  %v1123_v62 = vsub.f32 %v1112_v55, %v1121_v61 }
 0x635   :  { %v1126_v63 = vmul.f32 1.442695, %v1123_v62 }
 0x637   :  { %3762 = vpow2.f32 %v1126_v63 }
 0x640   :  { %v3761_v2 = vpop.eup %3760 }
 0x641   :  { %v1128_v3 = vsel %vm378_vm2, %v3761_v2, 0.0 }
 0x642   :  { %1129 = vadd.xlane.f32.xlu0 %v1128_v3 }
 0x644   :  { %v3763_v4 = vpop.eup %3762 }
 0x645   :  { %v1131_v5 = vsel %vm378_vm2, %v3763_v4, 0.0 }
 0x646   :  { %1132 = vadd.xlane.f32.xlu1 %v1131_v5 }
 0x6cb   :  { %v1130_v7 = vpop.xlane.xlu0 %1129 }
 0x6cc   :  { %3764 = vrcp.f32 %v1130_v7 }
 0x6cf   :  { %v1133_v8 = vpop.xlane.xlu1 %1132 }
 0x6d0   :  { %3766 = vrcp.f32 %v1133_v8 }
 0x6d9   :  { %v3765_v9 = vpop.eup %3764 }
 0x6da   :  { %v1135_v10 = vmul.f32 %v3765_v9, %v3761_v2 }
 0x6dc   :  { %3552 = vmatmul.mubr.msk.f32.vlgmr.msra.gmra.mxu0 %vm378_vm2, %v1135_v10 }
 0x6dd   :  { %v3767_v11 = vpop.eup %3766  ;;  %3560 = vmatpush3.msra.mxu0 %v3228_v17  ;;  %v3284_v17 = vld [vmem:[%s4462_s5 + $0x70] sm:$0xff] }
 0x6de   :  { %v1137_v12 = vmul.f32 %v3767_v11, %v3763_v4  ;;  %3569 = vmatprep.subr.mxu0 %v3236_v18 }
 0x6e0   :  { %3557 = vmatmul.mubr.msk.f32.vlgmr.msra.gmra.mxu1 %vm378_vm2, %v1137_v12 }
 0x6e1   :  { %3566 = vmatprep.mubr.msk.f32.mxu1 %vm378_vm2, %v4108_v30  ;;  %3565 = vmatpush3.msra.mxu1 %v699_v6  ;;  %v3246_v30 = vld [vmem:[%s4464_s7 + $0x2] ss:$0 sm:$0xff]  ;;  %v3269_v6 = vld [vmem:[%s4487_s26 + $0x78] sm:$0xff] }
 0x6e2   :  { %3580 = vmatprep.subr.mxu1 %v3244_v13 }
 0x6e4   :  { %3567 = vmatmul.mubr.msk.f32.vlgmr.msra.gmra.mxu1 %vm378_vm2, %v4110_v33 }
 0x6e5   :  { %3581 = vmatpush3.msra.mxu1 %v3244_v13  ;;  %3588 = vmatprep.mubr.msk.f32.mxu1 %vm68_vm0, %v3986_v31  ;;  %v3268_v13 = vld [vmem:[%s4487_s26 + $0x70] sm:$0xff] }
 0x6e6   :  { %3582 = vmatprep.subr.mxu1 %v3243_v14 }
 0x6e7   :  { %3583 = vmatpush3.msra.mxu1 %v3243_v14  ;;  %v3267_v14 = vld [vmem:[%s4487_s26 + $0x68] sm:$0xff] }
 0x6e8   :  { %3584 = vmatprep.subr.mxu1 %v3242_v15 }
 0x6e9   :  { %3585 = vmatpush3.msra.mxu1 %v3242_v15  ;;  %v3266_v15 = vld [vmem:[%s4487_s26 + $0x60] sm:$0xff] }
 0x6ea   :  { %3586 = vmatprep.subr.mxu1 %v3241_v16 }
 0x6eb   :  { %3587 = vmatpush3.msra.mxu1 %v3241_v16  ;;  %v3285_v16 = vld [vmem:[%s4462_s5 + $0x78] sm:$0xff] }
 0x6ec   :  { %3589 = vmatmul.mubr.msk.f32.vlgmr.msra.gmra.mxu1 %vm68_vm0, %v3990_v34  ;;  %3602 = vmatprep.subr.mxu1 %v3836_v42 }
 0x6ed   :  { %3604 = vmatprep.mubr.msk.f32.mxu1 %vm3837_vm1, %v3836_v42 }
 0x79c   :  { %v1207_v19 = vpop.f32.mrf.mxu0 }
 0x79d   :  { %3561 = vmatprep.mubr.msk.f32.mxu0 %vm378_vm2, %v1207_v19  ;;  %v3282_v19 = vld [vmem:[%s4462_s5 + $0x60] sm:$0xff] }
 0x79e   :  { %v3553_v20 = vpop.f32.mrf.mxu0 }
 0x79f   :  { %v3263_v20 = vld [vmem:[%s4466_s9 + $0x10] sm:$0xff] }
 0x7a0   :  { %v1280_v21 = vpop.f32.mrf.mxu1 }
 0x7a1   :  { %3562 = vmatmul.mubr.msk.f32.vlgmr.msra.gmra.mxu0 %vm378_vm2, %v1280_v21  ;;  %v3277_v21 = vld [vmem:[%s4488_s22 + $0x78] sm:$0xff] }
 0x7a2   :  { %3570 = vmatpush3.msra.mxu0 %v3236_v18  ;;  %v3558_v23 = vpop.f32.mrf.mxu1  ;;  %3577 = vmatprep.mubr.msk.f32.mxu0 %vm68_vm0, %v3986_v31  ;;  %v3283_v18 = vld [vmem:[%s4462_s5 + $0x68] sm:$0xff] }
 0x7a3   :  { %3571 = vmatprep.subr.mxu0 %v3235_v22 }
 0x7a4   :  { %3572 = vmatpush3.msra.mxu0 %v3235_v22  ;;  %v4182_v26 = vpop.f32.mrf.mxu1 }
 0x7a5   :  { %3573 = vmatprep.subr.mxu0 %v3234_v24 }
 0x7a6   :  { %3574 = vmatpush3.msra.mxu0 %v3234_v24  ;;  %v4192_v29 = vpop.f32.mrf.mxu1 }
 0x7a7   :  { %3575 = vmatprep.subr.mxu0 %v3233_v25 }
 0x7a8   :  { %3576 = vmatpush3.msra.mxu0 %v3233_v25  ;;  %v3276_v25 = vld [vmem:[%s4488_s22 + $0x70] sm:$0xff] }
 0x7a9   :  { %3578 = vmatmul.mubr.msk.f32.vlgmr.msra.gmra.mxu0 %vm68_vm0, %v3990_v34  ;;  %3591 = vmatprep.subr.mxu0 %v3252_v27 }
 0x7aa   :  { %3592 = vmatpush3.msra.mxu0 %v3252_v27  ;;  %3599 = vmatprep.mubr.msk.f32.mxu0 %vm68_vm0, %v3986_v31 }
 0x7ab   :  { %3593 = vmatprep.subr.mxu0 %v3251_v28 }
 0x7ac   :  { %v3590_v33 = vpop.f32.mrf.mxu1  ;;  %3594 = vmatpush3.msra.mxu0 %v3251_v28  ;;  %v3275_v28 = vld [vmem:[%s4488_s22 + $0x68] sm:$0xff] }
 0x7ad   :  { %v1621_v36 = vadd.f32 %v3590_v33, %v3246_v30  ;;  %3595 = vmatprep.subr.mxu0 %v3250_v32  ;;  %v3287_v33 = vld [vmem:[%s4465_s8 + $0x3] ss:$0 sm:$0xff] }
 0x7ae   :  { %v1615_v37 = vpop.f32.mrf.mxu1  ;;  %3596 = vmatpush3.msra.mxu0 %v3250_v32 }
 0x7af   :  { %v1616_v38 = vadd.f32 %v3246_v30, %v1615_v37  ;;  %3597 = vmatprep.subr.mxu0 %v3249_v35  ;;  %v3274_v30 = vld [vmem:[%s4488_s22 + $0x60] sm:$0xff] }
 0x7b0   :  { %3598 = vmatpush3.msra.mxu0 %v3249_v35 }
 0x7b1   :  { %3600 = vmatmul.mubr.msk.f32.vlgmr.msra.gmra.mxu0 %vm68_vm0, %v3990_v34  ;;  %3603 = vmatpush3.xpose.msk.msra.mxu1 %vm378_vm2, %v1616_v38 }
 0x7b2   :  { %3607 = vmatprep.subr.mxu1 %v3836_v42  ;;  %3612 = vmatprep.subr.mxu0 %v3836_v42 }
 0x7b3   :  { %3614 = vmatprep.mubr.msk.f32.mxu0 %vm3837_vm1, %v3836_v42 }
 0x861   :  { %v4212_v39 = vpop.f32.mrf.mxu0 }
 0x863   :  { %v4214_v40 = vpop.f32.mrf.mxu0 }
 0x869   :  { %v3579_v41 = vpop.f32.mrf.mxu0 }
 0x86a   :  { %v1533_v47 = vadd.f32 %v3579_v41, %v3238_v43  ;;  %v1445_v41 = vadd.f32 %v4182_v26, %v4212_v39 }
 0x86b   :  { %v1527_v44 = vpop.f32.mrf.mxu0 }
 0x86c   :  { %v1528_v45 = vadd.f32 %v3238_v43, %v1527_v44  ;;  %v1440_v43 = vadd.f32 %v4192_v29, %v4214_v40 }
 0x86e   :  { %3605 = vmatmul.mubr.msk.f32.vlgmr.msra.gmra.mxu1 %vm378_vm2, %v1528_v45 }
 0x86f   :  { %3608 = vmatpush3.xpose.msk.msra.mxu1 %vm378_vm2, %v1621_v36  ;;  %3609 = vmatprep.mubr.msk.f32.mxu1 %vm3837_vm1, %v3836_v42 }
 0x870   :  { %3617 = vmatprep.subr.mxu1 %v3836_v42 }
 0x871   :  { %v3601_v48 = vpop.f32.mrf.mxu0 }
 0x872   :  { %v1709_v49 = vadd.f32 %v3601_v48, %v3254_v46  ;;  %3610 = vmatmul.mubr.msk.f32.vlgmr.msra.gmra.mxu1 %vm378_vm2, %v1533_v47  ;;  %v3279_v48 = vld [vmem:[%s4464_s7 + $0x3] ss:$0 sm:$0xff] }
 0x873   :  { %v1703_v50 = vpop.f32.mrf.mxu0  ;;  %3619 = vmatprep.mubr.msk.f32.mxu1 %vm3837_vm1, %v3836_v42 }
 0x874   :  { %v1704_v51 = vadd.f32 %v3254_v46, %v1703_v50  ;;  %3618 = vmatpush3.msra.mxu1 %v1709_v49 }
 0x875   :  { %3627 = vmatprep.subr.mxu1 %v3269_v6 }
 0x876   :  { %3613 = vmatpush3.msra.mxu0 %v1704_v51  ;;  %v3271_v51 = vld [vmem:[%s4463_s6 + $0x3] ss:$0 sm:$0xff] }
 0x877   :  { %3622 = vmatprep.subr.mxu0 %v3263_v20 }
 0x92e   :  { %v1784_v52 = vpop.f32.mrf.mxu1 }
 0x92f   :  { %v1864_v53 = vsel %vm378_vm2, %v1784_v52, -inf }
 0x930   :  { %1865 = vmax.xlane.f32.xlu0 %v1864_v53  ;;  %v3606_v54 = vpop.f32.mrf.mxu1 }
 0x932   :  { %v1860_v55 = vpop.f32.mrf.mxu1 }
 0x933   :  { %v1867_v56 = vsel %vm378_vm2, %v1860_v55, -inf }
 0x934   :  { %1868 = vmax.xlane.f32.xlu1 %v1867_v56  ;;  %v3611_v57 = vpop.f32.mrf.mxu1 }
 0x9b9   :  { %v1866_v58 = vpop.xlane.xlu0 %1865 }
 0x9ba   :  { %v1870_v59 = vsub.f32 %v1784_v52, %v1866_v58 }
 0x9bc   :  { %v1872_v60 = vmul.f32 1.442695, %v1870_v59 }
 0x9bd   :  { %v1869_v61 = vpop.xlane.xlu1 %1868 }
 0x9be   :  { %3768 = vpow2.f32 %v1872_v60  ;;  %v1871_v62 = vsub.f32 %v1860_v55, %v1869_v61 }
 0x9c0   :  { %v1874_v63 = vmul.f32 1.442695, %v1871_v62 }
 0x9c2   :  { %3770 = vpow2.f32 %v1874_v63 }
 0x9cb   :  { %v3769_v2 = vpop.eup %3768 }
 0x9cc   :  { %v1876_v3 = vsel %vm378_vm2, %v3769_v2, 0.0 }
 0x9cd   :  { %1877 = vadd.xlane.f32.xlu0 %v1876_v3 }
 0x9cf   :  { %v3771_v4 = vpop.eup %3770 }
 0x9d0   :  { %v1879_v5 = vsel %vm378_vm2, %v3771_v4, 0.0 }
 0x9d1   :  { %1880 = vadd.xlane.f32.xlu1 %v1879_v5 }
 0xa56   :  { %v1878_v7 = vpop.xlane.xlu0 %1877 }
 0xa57   :  { %3772 = vrcp.f32 %v1878_v7 }
 0xa5a   :  { %v1881_v8 = vpop.xlane.xlu1 %1880 }
 0xa5b   :  { %3774 = vrcp.f32 %v1881_v8 }
 0xa64   :  { %v3773_v9 = vpop.eup %3772 }
 0xa65   :  { %v1883_v10 = vmul.f32 %v3773_v9, %v3769_v2 }
 0xa67   :  { %3615 = vmatmul.mubr.msk.f32.vlgmr.msra.gmra.mxu0 %vm378_vm2, %v1883_v10 }
 0xa68   :  { %v3775_v11 = vpop.eup %3774  ;;  %3623 = vmatpush3.msra.mxu0 %v3263_v20 }
 0xa69   :  { %v1885_v12 = vmul.f32 %v3775_v11, %v3771_v4  ;;  %3638 = vmatprep.subr.mxu0 %v3277_v21  ;;  %v3296_v11 = vld [vmem:[%s4466_s9 + $0x18] sm:$0xff] }
 0xa6b   :  { %3620 = vmatmul.mubr.msk.f32.vlgmr.msra.gmra.mxu1 %vm378_vm2, %v1885_v12 }
 0xa6c   :  { %3628 = vmatpush3.msra.mxu1 %v3269_v6  ;;  %3635 = vmatprep.mubr.msk.f32.mxu1 %vm68_vm0, %v3986_v31 }
 0xa6d   :  { %3629 = vmatprep.subr.mxu1 %v3268_v13 }
 0xa6e   :  { %3630 = vmatpush3.msra.mxu1 %v3268_v13 }
 0xa6f   :  { %3631 = vmatprep.subr.mxu1 %v3267_v14 }
 0xa70   :  { %3632 = vmatpush3.msra.mxu1 %v3267_v14 }
 0xa71   :  { %3633 = vmatprep.subr.mxu1 %v3266_v15 }
 0xa72   :  { %3634 = vmatpush3.msra.mxu1 %v3266_v15 }
 0xa73   :  { %3636 = vmatmul.mubr.msk.f32.vlgmr.msra.gmra.mxu1 %vm68_vm0, %v3990_v34  ;;  %3649 = vmatprep.subr.mxu1 %v3285_v16 }
 0xa74   :  { %3650 = vmatpush3.msra.mxu1 %v3285_v16  ;;  %3657 = vmatprep.mubr.msk.f32.mxu1 %vm68_vm0, %v3986_v31 }
 0xa75   :  { %3651 = vmatprep.subr.mxu1 %v3284_v17 }
 0xa76   :  { %3652 = vmatpush3.msra.mxu1 %v3284_v17 }
 0xa77   :  { %3653 = vmatprep.subr.mxu1 %v3283_v18 }
 0xa78   :  { %3654 = vmatpush3.msra.mxu1 %v3283_v18  ;;  %v3299_v18 = vld [vmem:[%s4467_s10] ss:$0 sm:$0xff] }
 0xa79   :  { %3655 = vmatprep.subr.mxu1 %v3282_v19 }
 0xa7a   :  { %3656 = vmatpush3.msra.mxu1 %v3282_v19 }
 0xa7b   :  { %3658 = vmatmul.mubr.msk.f32.vlgmr.msra.gmra.mxu1 %vm68_vm0, %v3990_v34  ;;  %3670 = vmatprep.subr.mxu1 %v3836_v42 }
 0xa7c   :  { %3672 = vmatprep.mubr.msk.f32.mxu1 %vm3837_vm1, %v3836_v42 }
 0xb27   :  { %v1955_v22 = vpop.f32.mrf.mxu0 }
 0xb28   :  { %3624 = vmatprep.mubr.msk.f32.mxu0 %vm378_vm2, %v1955_v22 }
 0xb29   :  { %v3616_v23 = vpop.f32.mrf.mxu0 }
 0xb2b   :  { %v2028_v24 = vpop.f32.mrf.mxu1 }
 0xb2c   :  { %3625 = vmatmul.mubr.msk.f32.vlgmr.msra.gmra.mxu0 %vm378_vm2, %v2028_v24 }
 0xb2d   :  { %3639 = vmatpush3.msra.mxu0 %v3277_v21  ;;  %v3621_v27 = vpop.f32.mrf.mxu1  ;;  %3646 = vmatprep.mubr.msk.f32.mxu0 %vm68_vm0, %v3986_v31 }
 0xb2e   :  { %3640 = vmatprep.subr.mxu0 %v3276_v25 }
 0xb2f   :  { %3641 = vmatpush3.msra.mxu0 %v3276_v25 }
 0xb30   :  { %3642 = vmatprep.subr.mxu0 %v3275_v28 }
 0xb31   :  { %3643 = vmatpush3.msra.mxu0 %v3275_v28 }
 0xb32   :  { %3644 = vmatprep.subr.mxu0 %v3274_v30 }
 0xb33   :  { %3645 = vmatpush3.msra.mxu0 %v3274_v30  ;;  %v3637_v31 = vpop.f32.mrf.mxu1 }
 0xb34   :  { %3647 = vmatmul.mubr.msk.f32.vlgmr.msra.gmra.mxu0 %vm68_vm0, %v3990_v34  ;;  %3660 = vmatprep.subr.mxu0 %v3836_v42  ;;  %v2202_v39 = vadd.f32 %v3637_v31, %v3271_v51 }
 0xb35   :  { %3662 = vmatprep.mubr.msk.f32.mxu0 %vm3837_vm1, %v3836_v42  ;;  %v2196_v32 = vpop.f32.mrf.mxu1 }
 0xb36   :  { %v2197_v26 = vadd.f32 %v3271_v51, %v2196_v32 }
 0xb3b   :  { %v3659_v35 = vpop.f32.mrf.mxu1 }
 0xb3c   :  { %v2378_v36 = vadd.f32 %v3659_v35, %v3287_v33 }
 0xb3d   :  { %v2372_v37 = vpop.f32.mrf.mxu1 }
 0xb3e   :  { %v2373_v38 = vadd.f32 %v3287_v33, %v2372_v37 }
 0xb40   :  { %3671 = vmatpush3.msra.mxu1 %v2373_v38  ;;  %v2844_v38 = vld [vmem:[%s4470_s13 + $0x18] sm:$0xff] }
 0xb41   :  { %3680 = vmatprep.subr.mxu1 %v3296_v11 }
 0xbec   :  { %v3626_v34 = vpop.f32.mrf.mxu0 }
 0xbed   :  { %v2116_v44 = vadd.f32 %v3626_v34, %v1445_v41  ;;  %v2843_v41 = vld [vmem:[%s4470_s13 + $0x10] sm:$0xff]  ;;  %v2842_v34 = vld [vmem:[%s4470_s13 + $0x8] sm:$0xff] }
 0xbee   :  { %v2106_v45 = vpop.f32.mrf.mxu0 }
 0xbef   :  { %v4302_v46 = vadd.f32 %v2106_v45, %v1440_v43  ;;  %v2841_v43 = vld [vmem:[%s4470_s13] sm:$0xff]  ;;  %v2957_v45 = vld [vmem:[%s4472_s15 + $0x70] sm:$0xff] }
 0xbf4   :  { %v3648_v47 = vpop.f32.mrf.mxu0 }
 0xbf5   :  { %v2290_v29 = vadd.f32 %v3648_v47, %v3279_v48 }
 0xbf6   :  { %v2284_v49 = vpop.f32.mrf.mxu0 }
 0xbf7   :  { %v2285_v50 = vadd.f32 %v3279_v48, %v2284_v49 }
 0xbf9   :  { %3661 = vmatpush3.xpose.msk.msra.mxu0 %vm378_vm2, %v2285_v50 }
 0xbfa   :  { %3665 = vmatprep.subr.mxu0 %v3836_v42 }
 0xbfc   :  { %3663 = vmatmul.mubr.msk.f32.vlgmr.msra.gmra.mxu0 %vm378_vm2, %v2197_v26 }
 0xbfd   :  { %3666 = vmatpush3.xpose.msk.msra.mxu0 %vm378_vm2, %v2290_v29  ;;  %3667 = vmatprep.mubr.msk.f32.mxu0 %vm3837_vm1, %v3836_v42 }
 0xbfe   :  { %3675 = vmatprep.subr.mxu0 %v3836_v42 }
 0xc00   :  { %3668 = vmatmul.mubr.msk.f32.vlgmr.msra.gmra.mxu0 %vm378_vm2, %v2202_v39 }
 0xc01   :  { %3676 = vmatpush3.msra.mxu0 %v2378_v36  ;;  %3677 = vmatprep.mubr.msk.f32.mxu0 %vm3837_vm1, %v3836_v42 }
 0xc02   :  { %3685 = vmatprep.subr.mxu0 %v2844_v38 }
 0xcbc   :  { %v2453_v40 = vpop.f32.mrf.mxu0 }
 0xcbd   :  { %v2533_v52 = vsel %vm378_vm2, %v2453_v40, -inf }
 0xcbe   :  { %2534 = vmax.xlane.f32.xlu0 %v2533_v52  ;;  %v3664_v53 = vpop.f32.mrf.mxu0 }
 0xcc0   :  { %v2529_v54 = vpop.f32.mrf.mxu0 }
 0xcc1   :  { %v2536_v55 = vsel %vm378_vm2, %v2529_v54, -inf }
 0xcc2   :  { %2537 = vmax.xlane.f32.xlu1 %v2536_v55  ;;  %v3669_v56 = vpop.f32.mrf.mxu0 }
 0xcc3   :  { %v3301_v56 = vld [vmem:[%s4469_s12] ss:$0 sm:$0xff] }
 0xd47   :  { %v2535_v57 = vpop.xlane.xlu0 %2534 }
 0xd48   :  { %v2539_v58 = vsub.f32 %v2453_v40, %v2535_v57  ;;  %v3300_v40 = vld [vmem:[%s4468_s11] ss:$0 sm:$0xff] }
 0xd4a   :  { %v2541_v59 = vmul.f32 1.442695, %v2539_v58 }
 0xd4b   :  { %v2538_v60 = vpop.xlane.xlu1 %2537 }
 0xd4c   :  { %3776 = vpow2.f32 %v2541_v59  ;;  %v2540_v61 = vsub.f32 %v2529_v54, %v2538_v60  ;;  %v2955_v59 = vld [vmem:[%s4472_s15 + $0x60] sm:$0xff]  ;;  %v2954_v60 = vld [vmem:[%s4472_s15 + $0x58] sm:$0xff] }
 0xd4e   :  { %v2543_v62 = vmul.f32 1.442695, %v2540_v61  ;;  %v2953_v61 = vld [vmem:[%s4472_s15 + $0x50] sm:$0xff] }
 0xd50   :  { %3778 = vpow2.f32 %v2543_v62  ;;  %v2952_v62 = vld [vmem:[%s4472_s15 + $0x48] sm:$0xff] }
 0xd59   :  { %v3777_v63 = vpop.eup %3776 }
 0xd5a   :  { %v2545_v2 = vsel %vm378_vm2, %v3777_v63, 0.0 }
 0xd5b   :  { %2546 = vadd.xlane.f32.xlu0 %v2545_v2  ;;  %v2950_v2 = vld [vmem:[%s4472_s15 + $0x38] sm:$0xff] }
 0xd5d   :  { %v3779_v3 = vpop.eup %3778 }
 0xd5e   :  { %v2548_v4 = vsel %vm378_vm2, %v3779_v3, 0.0 }
 0xd5f   :  { %2549 = vadd.xlane.f32.xlu1 %v2548_v4  ;;  %v2948_v4 = vld [vmem:[%s4472_s15 + $0x28] sm:$0xff] }
 0xde4   :  { %v2547_v5 = vpop.xlane.xlu0 %2546 }
 0xde5   :  { %3780 = vrcp.f32 %v2547_v5  ;;  %v2947_v5 = vld [vmem:[%s4472_s15 + $0x20] sm:$0xff] }
 0xde8   :  { %v2550_v6 = vpop.xlane.xlu1 %2549 }
 0xde9   :  { %3782 = vrcp.f32 %v2550_v6  ;;  %v2946_v6 = vld [vmem:[%s4472_s15 + $0x18] sm:$0xff] }
 0xdf2   :  { %v3781_v7 = vpop.eup %3780 }
 0xdf3   :  { %v2552_v8 = vmul.f32 %v3781_v7, %v3777_v63  ;;  %v2951_v63 = vld [vmem:[%s4472_s15 + $0x40] sm:$0xff]  ;;  %v2945_v7 = vld [vmem:[%s4472_s15 + $0x10] sm:$0xff] }
 0xdf5   :  { %3673 = vmatmul.mubr.msk.f32.vlgmr.msra.gmra.mxu1 %vm378_vm2, %v2552_v8  ;;  %v2944_v8 = vld [vmem:[%s4472_s15 + $0x8] sm:$0xff] }
 0xdf6   :  { %v3783_v9 = vpop.eup %3782  ;;  %3681 = vmatpush3.msra.mxu1 %v3296_v11 }
 0xdf7   :  { %v2554_v10 = vmul.f32 %v3783_v9, %v3779_v3  ;;  %v2949_v3 = vld [vmem:[%s4472_s15 + $0x30] sm:$0xff]  ;;  %v2943_v9 = vld [vmem:[%s4472_s15] sm:$0xff] }
 0xdf9   :  { %3678 = vmatmul.mubr.msk.f32.vlgmr.msra.gmra.mxu0 %vm378_vm2, %v2554_v10  ;;  %v3302_v10 = vld [vmem:[%s4471_s14] ss:$0 sm:$0xff] }
 0xdfa   :  { %3686 = vmatpush3.msra.mxu0 %v2844_v38 }
 0xdfb   :  { %3687 = vmatprep.subr.mxu0 %v2843_v41 }
 0xdfc   :  { %3688 = vmatpush3.msra.mxu0 %v2843_v41 }
 0xdfd   :  { %3689 = vmatprep.subr.mxu0 %v2842_v34 }
 0xdfe   :  { %3690 = vmatpush3.msra.mxu0 %v2842_v34 }
 0xdff   :  { %3691 = vmatprep.subr.mxu0 %v2841_v43 }
 0xe00   :  { %3692 = vmatpush3.msra.mxu0 %v2841_v43 }
 0xe01   :  { %3731 = vmatprep.subr.mxu0 %v3836_v42 }
 0xeb5   :  { %v2624_v12 = vpop.f32.mrf.mxu1 }
 0xeb6   :  { %3682 = vmatprep.mubr.msk.f32.mxu1 %vm378_vm2, %v2624_v12 }
 0xeb7   :  { %v3674_v13 = vpop.f32.mrf.mxu1 }
 0xeb9   :  { %v2697_v14 = vpop.f32.mrf.mxu0 }
 0xeba   :  { %3683 = vmatmul.mubr.msk.f32.vlgmr.msra.gmra.mxu1 %vm378_vm2, %v2697_v14 }
 0xebb   :  { %v3679_v15 = vpop.f32.mrf.mxu0 }
 0xf7a   :  { %v3684_v16 = vpop.f32.mrf.mxu1 }
 0xf7b   :  { %v2785_v17 = vadd.f32 %v3684_v16, %v2116_v44  ;;  %v2958_v44 = vld [vmem:[%s4472_s15 + $0x78] sm:$0xff] }
 0xf7c   :  { %v2775_v19 = vpop.f32.mrf.mxu1  ;;  %3696 = vmatprep.subr.mxu1 %v2958_v44 }
 0xf7d   :  { %v2787_v20 = vadd.f32 %v2785_v17, %v3955_v1  ;;  %v2784_v21 = vadd.f32 %v2775_v19, %v4302_v46  ;;  %3697 = vmatpush3.msra.mxu1 %v2958_v44  ;;  %v2956_v46 = vld [vmem:[%s4472_s15 + $0x68] sm:$0xff] }
 0xf7e   :  { %3698 = vmatprep.subr.mxu1 %v2957_v45 }
 0xf7f   :  { %v4336_v22 = vadd.f32 %v3299_v18, %v2787_v20  ;;  %v2786_v23 = vadd.f32 %v2784_v21, %v3950_v0  ;;  %3699 = vmatpush3.msra.mxu1 %v2957_v45 }
 0xf80   :  { %3700 = vmatprep.subr.mxu1 %v2956_v46 }
 0xf81   :  { %v4339_v24 = vadd.f32 %v3299_v18, %v2786_v23  ;;  %v2800_v25 = vsel %vm68_vm0, %v4336_v22, 0.0  ;;  %3701 = vmatpush3.msra.mxu1 %v2956_v46 }
 0xf82   :  { %2801 = vadd.xlane.f32.xlu1 %v2800_v25  ;;  %3702 = vmatprep.subr.mxu1 %v2955_v59 }
 0xf83   :  { %v2797_v27 = vsel %vm68_vm0, %v4339_v24, 0.0  ;;  %3703 = vmatpush3.msra.mxu1 %v2955_v59 }
 0xf84   :  { %2798 = vadd.xlane.f32.xlu0 %v2797_v27  ;;  %3704 = vmatprep.subr.mxu1 %v2954_v60 }
 0xf85   :  { %3705 = vmatpush3.msra.mxu1 %v2954_v60 }
 0xf86   :  { %3706 = vmatprep.subr.mxu1 %v2953_v61 }
 0xf87   :  { %3707 = vmatpush3.msra.mxu1 %v2953_v61 }
 0xf88   :  { %3708 = vmatprep.subr.mxu1 %v2952_v62 }
 0xf89   :  { %3709 = vmatpush3.msra.mxu1 %v2952_v62 }
 0xf8a   :  { %3710 = vmatprep.subr.mxu1 %v2951_v63 }
 0xf8b   :  { %3711 = vmatpush3.msra.mxu1 %v2951_v63 }
 0xf8c   :  { %3712 = vmatprep.subr.mxu1 %v2950_v2 }
 0xf8d   :  { %3713 = vmatpush3.msra.mxu1 %v2950_v2 }
 0xf8e   :  { %3714 = vmatprep.subr.mxu1 %v2949_v3 }
 0xf8f   :  { %3715 = vmatpush3.msra.mxu1 %v2949_v3 }
 0xf90   :  { %3716 = vmatprep.subr.mxu1 %v2948_v4 }
 0xf91   :  { %3717 = vmatpush3.msra.mxu1 %v2948_v4 }
 0xf92   :  { %3718 = vmatprep.subr.mxu1 %v2947_v5 }
 0xf93   :  { %3719 = vmatpush3.msra.mxu1 %v2947_v5 }
 0xf94   :  { %3720 = vmatprep.subr.mxu1 %v2946_v6 }
 0xf95   :  { %3721 = vmatpush3.msra.mxu1 %v2946_v6 }
 0xf96   :  { %3722 = vmatprep.subr.mxu1 %v2945_v7 }
 0xf97   :  { %3723 = vmatpush3.msra.mxu1 %v2945_v7 }
 0xf98   :  { %3724 = vmatprep.subr.mxu1 %v2944_v8 }
 0xf99   :  { %3725 = vmatpush3.msra.mxu1 %v2944_v8 }
 0xf9a   :  { %3726 = vmatprep.subr.mxu1 %v2943_v9 }
 0xf9b   :  { %3727 = vmatpush3.msra.mxu1 %v2943_v9 }
0x100b   :  { %v2802_v28 = vpop.xlane.xlu1 %2801 }
0x100c   :  { %v2804_v30 = vmul.f32 0.03125, %v2802_v28  ;;  %v3065_v28 = vld [vmem:[%s4474_s17 + $0x18] sm:$0xff] }
0x100d   :  { %v2799_v31 = vpop.xlane.xlu0 %2798 }
0x100e   :  { %v2806_v1 = vsub.f32 %v4336_v22, %v2804_v30  ;;  %v2803_v32 = vmul.f32 0.03125, %v2799_v31  ;;  %v3064_v30 = vld [vmem:[%s4474_s17 + $0x10] sm:$0xff]  ;;  %v3063_v31 = vld [vmem:[%s4474_s17 + $0x8] sm:$0xff] }
0x1010   :  { %v2805_v33 = vsub.f32 %v4339_v24, %v2803_v32  ;;  %v2808_v35 = vmul.f32 %v2806_v1, %v2806_v1  ;;  %v3305_v32 = vld [vmem:[%s4473_s16] ss:$0 sm:$0xff]  ;;  %s3838_s16 = smov [#allocation2]  }
0x1012   :  { %v2812_v0 = vsel %vm68_vm0, %v2808_v35, 0.0  ;;  %v2807_v36 = vmul.f32 %v2805_v33, %v2805_v33 }
0x1013   :  { %2813 = vadd.xlane.f32.xlu1 %v2812_v0 }
0x1014   :  { %v2809_v37 = vsel %vm68_vm0, %v2807_v36, 0.0 }
0x1015   :  { %2810 = vadd.xlane.f32.xlu0 %v2809_v37 }
0x109c   :  { %v2814_v47 = vpop.xlane.xlu1 %2813 }
0x109d   :  { %v2816_v48 = vmul.f32 0.03125, %v2814_v47 }
0x109e   :  { %v2811_v49 = vpop.xlane.xlu0 %2810 }
0x109f   :  { %v2818_v50 = vadd.f32 1e-05, %v2816_v48  ;;  %v2815_v51 = vmul.f32 0.03125, %v2811_v49 }
0x10a1   :  { %3784 = vrsqrt.f32 %v2818_v50  ;;  %v2817_v26 = vadd.f32 1e-05, %v2815_v51 }
0x10a3   :  { %3786 = vrsqrt.f32 %v2817_v26 }
0x10ae   :  { %v3785_v29 = vpop.eup %3784 }
0x10af   :  { %v2822_v39 = vmul.f32 %v3785_v29, %v2806_v1  ;;  %v3062_v1 = vld [vmem:[%s4474_s17] sm:$0xff]  ;;  %s3156_s17 = sshll.u32 %s3838_s16, 4  ;;  %s3157_s17 = int_to_ptr.vmem [resolvable:$true] %s3156_s17 }
0x10b0   :  { %v3787_v52 = vpop.eup %3786  ;;  %s3792_s27 = scalar_lea.vmem %s3157_s17, 256  ;;  %p3797_p1 = scmp.lt.s32.totalorder %s3157_s17, %s3157_s17 }
0x10b1   :  { %v2821_v53 = vmul.f32 %v3787_v52, %v2805_v33  ;;  %v2831_v54 = vmul.f32 %v3300_v40, %v2822_v39  ;;  %p3793_p0 = scmp.ne.s32.totalorder %s3157_s17, %s3792_s27  ;;  %p3798_p2 = scmp.lt.s32.totalorder %s3792_s27, %s3792_s27 }
0x10b3   :  { %v2830_v55 = vmul.f32 %v3300_v40, %v2821_v53  ;;  %v2840_v58 = vadd.f32 %v3301_v56, %v2831_v54  ;;  %p3799_p3 = por %p3798_p2, %p3797_p1 }
0x10b5   :  { %v2839_v57 = vadd.f32 %v3301_v56, %v2830_v55  ;;  %p3800_p4 = pnand %p3799_p3, %p3793_p0 }
0x10b7   :  { %3693 = vmatprep.mubr.msk.f32.mxu0 %vm68_vm0, %v2839_v57 }
0x10b8   :  { %3694 = vmatmul.mubr.msk.f32.vlgmr.msra.gmra.mxu0 %vm68_vm0, %v2840_v58 }
0x10b9   :  { %3739 = vmatprep.mubr.msk.f32.mxu0 %vm3837_vm1, %v3836_v42  ;;  %3732 = vmatpush3.msra.mxu0 %v3065_v28 }
0x10ba   :  { %3733 = vmatprep.subr.mxu0 %v3836_v42 }
0x10bb   :  { %3734 = vmatpush3.msra.mxu0 %v3064_v30 }
0x10bc   :  { %3735 = vmatprep.subr.mxu0 %v3836_v42 }
0x10bd   :  { %3736 = vmatpush3.msra.mxu0 %v3063_v31 }
0x10be   :  { %3737 = vmatprep.subr.mxu0 %v3836_v42 }
0x10bf   :  { %3738 = vmatpush3.msra.mxu0 %v3062_v1 }
0x1178   :  { %v3695_v11 = vpop.f32.mrf.mxu0 }
0x1179   :  { %v2930_v12 = vadd.f32 %v3695_v11, %v3302_v10 }
0x117a   :  { %v2924_v13 = vpop.f32.mrf.mxu0 }
0x117b   :  { %v2936_v14 = vmul.f32 0.70710677, %v2930_v12  ;;  %v2925_v15 = vadd.f32 %v3302_v10, %v2924_v13  ;;  %v2934_v23 = vmul.f32 0.5, %v2930_v12 }
0x117d   :  { %3788 = verf.f32 %v2936_v14  ;;  %v2935_v16 = vmul.f32 0.70710677, %v2925_v15  ;;  %v2933_v20 = vmul.f32 0.5, %v2925_v15 }
0x117f   :  { %3790 = verf.f32 %v2935_v16 }
0x118a   :  { %v3789_v17 = vpop.eup %3788 }
0x118b   :  { %v2940_v19 = vadd.f32 1.0, %v3789_v17 }
0x118c   :  { %v3791_v18 = vpop.eup %3790 }
0x118d   :  { %v2939_v21 = vadd.f32 1.0, %v3791_v18  ;;  %v2942_v27 = vmul.f32 %v2940_v19, %v2934_v23 }
0x118f   :  { %v2941_v25 = vmul.f32 %v2939_v21, %v2933_v20 }
0x1191   :  { %3728 = vmatprep.mubr.f32.mxu1 %v2941_v25 }
0x1192   :  { %3729 = vmatmul.mubr.f32.vlgmr.msra.gmra.mxu1 %v2942_v27 }
0x1252   :  { %v3730_v33 = vpop.f32.mrf.mxu1 }
0x1253   :  { %v3038_v35 = vadd.f32 %v3730_v33, %v3305_v32 }
0x1254   :  { %v3032_v0 = vpop.f32.mrf.mxu1 }
0x1255   :  { %v3042_v36 = vadd.f32 %v3038_v35, %v4336_v22  ;;  %v3033_v37 = vadd.f32 %v3305_v32, %v3032_v0 }
0x1257   :  { %3044 = vst.msk [vmem:[#allocation2 + $0x8] sm:$0xff] %vm68_vm0, %v3042_v36  ;;  %v3052_v38 = vsel %vm68_vm0, %v3042_v36, 0.0  ;;  %v3041_v41 = vadd.f32 %v3033_v37, %v4339_v24 }
0x1258   :  { %v3053_v34 = vrot.slane %v3052_v38, 4 }
0x1259   :  { %3043 = vst.msk [vmem:[#allocation2] sm:$0xff] %vm68_vm0, %v3041_v41  ;;  %v3045_v42 = vsel %vm68_vm0, %v3041_v41, 0.0 }
0x125a   :  { %v3054_v43 = vadd.f32 %v3053_v34, %v3052_v38  ;;  %v3046_v44 = vrot.slane %v3045_v42, 4 }
0x125c   :  { %v3055_v45 = vrot.slane %v3054_v43, 2  ;;  %v3047_v46 = vadd.f32 %v3046_v44, %v3045_v42 }
0x125e   :  { %v3056_v47 = vadd.f32 %v3055_v45, %v3054_v43  ;;  %v3048_v48 = vrot.slane %v3047_v46, 2 }
0x1260   :  { %v3057_v49 = vrot.slane %v3056_v47, 1  ;;  %v3049_v22 = vadd.f32 %v3048_v48, %v3047_v46 }
0x1262   :  { %v3058_v50 = vadd.f32 %v3057_v49, %v3056_v47  ;;  %v3050_v51 = vrot.slane %v3049_v22, 1 }
0x1264   :  { %v3051_v26 = vadd.f32 %v3050_v51, %v3049_v22  ;;  %v3061_v29 = vmul.f32 0.125, %v3058_v50 }
0x1266   :  { %v3060_v39 = vmul.f32 0.125, %v3051_v26 }
0x1268   :  { %v3076_v24 = vsel %vm3075_vm3, %v3061_v29, %v3060_v39 }
0x1269   :  { %3740 = vmatmul.mubr.msk.f32.vlgmr.msra.gmra.mxu0 %vm68_vm0, %v3076_v24 }
0x126a   :  { %3803 = shalt.err (!%p3800_p4)
}
0x126b   :  { %s3839_s28 = smov 128   ;;  %s3840_s4 = smov 8   ;;  %v3306_v40 = vld [vmem:[%s4475_s18] ss:$0 sm:$0xff]  ;;  %vm3149_vm4 = vcmask 254976  }
0x126c   :  { %3162 = dma.vmem_to_hbm [thread:$0]  %s3157_s17, 256, %s4476_s19, [#allocation3], %s3839_s28, %s3839_s28, %s3840_s4  }
0x126d   :  { %s3841_s22 = smov [#allocation4]  }
0x126e   :  { %s3169_s13 = sshll.u32 %s3841_s22, 4  ;;  %s3170_s13 = int_to_ptr.vmem [resolvable:$true] %s3169_s13 }
0x126f   :  { %s3812_s21 = scalar_lea.vmem %s3170_s13, 32  ;;  %p3817_p6 = scmp.lt.s32.totalorder %s3170_s13, %s3170_s13 }
0x1270   :  { %p3813_p5 = scmp.ne.s32.totalorder %s3170_s13, %s3812_s21  ;;  %p3818_p7 = scmp.lt.s32.totalorder %s3812_s21, %s3812_s21 }
0x1272   :  { %p3819_p8 = por %p3818_p7, %p3817_p6 }
0x1274   :  { %p3820_p9 = pnand %p3819_p8, %p3813_p5 }
0x1329   :  { %v3145_v52 = vpop.f32.mrf.mxu0 }
0x132a   :  { %v3146_v53 = vadd.f32 %v3306_v40, %v3145_v52 }
0x132b   :  { %v3741_v54 = vpop.f32.mrf.mxu0 }
0x132c   :  { %3150 = vst.msk [vmem:[#allocation4] sm:$0x3] %vm3149_vm4, %v3146_v53 }
0x132d   :  { %3823 = shalt.err (!%p3820_p9)
}
0x132e   :  { %3172 = dma.vmem_to_hbm [thread:$0]  %s3170_s13, 32, %s4477_s20, [#allocation5]  }
0x132f   :  { %3832 = dma.done.wait [#allocation3], 256  }
0x1330   :  { %3833 = vsyncadd [#allocation3], 4294967040 }
0x1331   :  { %3834 = dma.done.wait [#allocation5], 32  }
0x1332   :  { %3835 = vsyncadd [#allocation5], 4294967264 }
0x1333   :  { %3179 = vsyncpa [#allocation3], 1 }
0x1334   :  { %3180 = vsyncpa [#allocation5], 1 }

</bundles_post_ra>
